<compile_context>
chip_gen: v7x
topology: tpu7x:2x2x1
jax: 0.10.0
libtpu: 0.0.40
codegen_flags: <defaults>
</compile_context>

<pallas_src>
import jax
import jax.numpy as jnp
from jax.experimental import pallas as pl
from jax.experimental.pallas import tpu as pltpu

EPS = 1e-5


# ----------------------------------------------------------------------------
# In-kernel helpers (static shapes, fully unrolled)
# ----------------------------------------------------------------------------
def _shifted_taps(a):
    """Four 2x2-window taps of `a` via XLU rotations.

    Order matches the weight layout: (ky, kx) = (0,0), (0,1), (1,0), (1,1).
    Positive shift (size-1) == jnp.roll(a, -1).  Wrapped rows/cols only land
    in positions that the valid conv / stride-2 pool output never reads.
    """
    rows, cols = a.shape
    r = pltpu.roll(a, cols - 1, axis=1)     # a[:, x+1]
    d = pltpu.roll(a, rows - 1, axis=0)     # a[y+1, :]
    rd = pltpu.roll(r, rows - 1, axis=0)    # a[y+1, x+1]
    return (a, r, d, rd)


def _window_max2x2(a):
    """Elementwise max over the 2x2 window anchored at each position (VPU+XLU)."""
    t0, t1, t2, t3 = _shifted_taps(a)
    return jnp.maximum(jnp.maximum(t0, t1), jnp.maximum(t2, t3))


# ----------------------------------------------------------------------------
# The single fused kernel
# ----------------------------------------------------------------------------
def _net_kernel(x_ref, w1l_ref, b1_ref, cp1_ref, rs1_ref,
                w2l_ref, b2_ref, cs2_ref, rs2_ref,
                fc1w_ref, fc1b_ref, fc2w_ref, fc2b_ref, out_ref):
    f32 = jnp.float32

    # ---- conv1 (+folded BN) + ReLU + maxpool, channel-packed lanes ----------
    x = x_ref[...]                                  # (N*32, 96), lane = ci*32+x
    taps = _shifted_taps(x)                         # 4 x (N*32, 96)
    W1 = 32
    placed = None                                   # pool-1 col-select+place acc
    for co in range(3):
        acc = None
        for k in range(4):
            w = w1l_ref[4 * co + k:4 * co + k + 1, :]            # (1, 96)
            t = taps[k] * w
            acc = t if acc is None else acc + t
        # reduce over the 3 channel lane-blocks -> (N*32, 32)
        ch = acc[:, 0:W1] + acc[:, W1:2 * W1] + acc[:, 2 * W1:3 * W1]
        h = jnp.maximum(ch + b1_ref[co], 0.0)                    # BN folded
        wm = _window_max2x2(h)                                   # (N*32, 32)
        # stride-2 column select + place channel co at lanes [co*16, co*16+15)
        a = jnp.dot(wm, cp1_ref[co], preferred_element_type=f32)  # (N*32, 48)
        placed = a if placed is None else placed + a
    # stride-2 row select for all images at once, 16-row-aligned image blocks
    p1 = jnp.dot(rs1_ref[...], placed, preferred_element_type=f32)  # (N*16, 48)

    # ---- conv2 (+folded BN) + ReLU + maxpool on packed (N*16, 48) -----------
    taps2 = _shifted_taps(p1)
    acc2 = None
    for k in range(4):
        w = w2l_ref[k:k + 1, :]                                  # (1, 48)
        t = taps2[k] * w
        acc2 = t if acc2 is None else acc2 + t
    W2 = 16
    ch2 = acc2[:, 0:W2] + acc2[:, W2:2 * W2] + acc2[:, 2 * W2:3 * W2]
    h2 = jnp.maximum(ch2 + b2_ref[0], 0.0)                       # (N*16, 16)
    wm2 = _window_max2x2(h2)                                     # (N*16, 16)
    # pool-2 selection into a flatten-ready stack: row 8r+m = image m, row r
    p2c = jnp.dot(wm2, cs2_ref[...], preferred_element_type=f32)  # (N*16, 8)
    p2 = jnp.dot(rs2_ref[...], p2c, preferred_element_type=f32)   # (56, 8)

    # ---- classifier: flatten + Linear(49,25) + Linear(25,10), batched -------
    hsum = None
    for r in range(7):                       # 8-aligned row blocks, whole batch
        g = jnp.dot(p2[8 * r:8 * r + 8, :], fc1w_ref[r],
                    preferred_element_type=f32)                  # (8, 25)
        hsum = g if hsum is None else hsum + g
    hidden = hsum + fc1b_ref[...]                                # (8, 25)
    logits = jnp.dot(hidden, fc2w_ref[...],
                     preferred_element_type=f32) + fc2b_ref[...]  # (8, 128)
    out_ref[...] = logits                    # single dense, lane-padded store


# ----------------------------------------------------------------------------
# Host-side wrapper: fold BN, build packed layouts / selection matrices,
# one pallas_call
# ----------------------------------------------------------------------------
def _fold_conv_bn(w, b, gamma, beta, mean, var):
    """Fold conv bias + eval-mode BatchNorm into conv weights (PyTorch OIHW)."""
    s = gamma / jnp.sqrt(var + EPS)
    return w * s[:, None, None, None], (b - mean) * s + beta


@jax.jit
def net_forward(x_nchw, params):
    n, c, h, w = x_nchw.shape
    assert (c, h, w) == (3, 32, 32), "kernel is specialized to 3x32x32 inputs"
    assert n <= 8, "TODO(synk): add a parallel batch grid axis for N > 8"
    f32 = jnp.float32

    w1e, b1e = _fold_conv_bn(params["conv1_w"], params["conv1_b"],
                             params["bn1_gamma"], params["bn1_beta"],
                             params["bn1_mean"], params["bn1_var"])
    w2e, b2e = _fold_conv_bn(params["conv2_w"], params["conv2_b"],
                             params["bn2_gamma"], params["bn2_beta"],
                             params["bn2_mean"], params["bn2_var"])

    # channel-packed input: (N*32, 3*32), lane = ci*32 + x  (75% lane occupancy)
    xp = jnp.transpose(x_nchw, (0, 2, 1, 3)).reshape(n * 32, 96)

    # conv1 lane weights: row 4*co + (2*ky+kx), lane ci*32 + x
    w1l = jnp.repeat(jnp.transpose(w1e, (0, 2, 3, 1)).reshape(3, 4, 3),
                     32, axis=-1).reshape(12, 96).astype(f32)
    # conv2 lane weights: row 2*ky+kx, lane ci*16 + x
    w2l = jnp.repeat(jnp.transpose(w2e[0], (1, 2, 0)).reshape(4, 3),
                     16, axis=-1).astype(f32)

    # pool-1 column stride-2 select + channel-place matrices (3, 32, 48)
    u = jnp.arange(32)[:, None]
    v = jnp.arange(48)[None, :]
    base = (u % 2 == 0) & (u // 2 < 15) & (v % 16 == u // 2)
    cp1 = jnp.stack([jnp.where(base & (v // 16 == co), 1.0, 0.0).astype(f32)
                     for co in range(3)])
    # pool-1 row stride-2 select, 16-row image blocks (row 15 = zero pad)
    i1 = jnp.arange(n * 16)[:, None]
    j1 = jnp.arange(n * 32)[None, :]
    rs1 = jnp.where((i1 % 16 < 15) & (j1 == (i1 // 16) * 32 + 2 * (i1 % 16)),
                    1.0, 0.0).astype(f32)                         # (N*16, N*32)
    # pool-2 column select (16 -> 8, column 7 = zero pad)
    u2 = jnp.arange(16)[:, None]
    c2 = jnp.arange(8)[None, :]
    cs2 = jnp.where((c2 < 7) & (u2 == 2 * c2), 1.0, 0.0).astype(f32)  # (16, 8)
    # pool-2 row select into the flatten-ready (56, 8) stack:
    #   output row 8*r + m  <-  pooled row r of image m (m < N), else zero
    i2 = jnp.arange(56)[:, None]
    j2 = jnp.arange(n * 16)[None, :]
    rs2 = jnp.where((i2 % 8 < n) & (j2 == (i2 % 8) * 16 + 2 * (i2 // 8)),
                    1.0, 0.0).astype(f32)                         # (56, N*16)

    # classifier weights: fc1 split into 8-aligned row blocks; fc2 lane-padded
    # (flatten order matches torch.flatten(x,1) exactly since conv2 has C=1)
    fc1w = jnp.zeros((7, 8, 25), f32).at[:, :7, :].set(
        params["fc1_w"].T.reshape(7, 7, 25))
    fc1b = params["fc1_b"].reshape(1, 25).astype(f32)
    fc2w = jnp.zeros((25, 128), f32).at[:, :10].set(params["fc2_w"].T)
    fc2b = jnp.zeros((1, 128), f32).at[:, :10].set(params["fc2_b"])

    vmem = pl.BlockSpec(memory_space=pltpu.MemorySpace.VMEM)
    smem = pl.BlockSpec(memory_space=pltpu.MemorySpace.SMEM)
    out_full = pl.pallas_call(
        _net_kernel,
        out_shape=jax.ShapeDtypeStruct((8, 128), f32),
        in_specs=[vmem, vmem, smem, vmem, vmem,
                  vmem, smem, vmem, vmem,
                  vmem, vmem, vmem, vmem],
        out_specs=vmem,
    )(xp, w1l, b1e, cp1, rs1, w2l, b2e, cs2, rs2, fc1w, fc1b, fc2w, fc2b)
    return out_full[:n, :10]


# ----------------------------------------------------------------------------
# Pure-JAX reference (eval-mode BN) and parameter init (PyTorch layouts)
# ----------------------------------------------------------------------------
def net_reference(x, p):
    def block(hh, w, b, gamma, beta, mean, var):
        y = jax.lax.conv_general_dilated(
            hh, w, window_strides=(1, 1), padding="VALID",
            dimension_numbers=("NCHW", "OIHW", "NCHW"))
        y = y + b[None, :, None, None]
        s = (gamma / jnp.sqrt(var + EPS))[None, :, None, None]
        y = (y - mean[None, :, None, None]) * s + beta[None, :, None, None]
        y = jnp.maximum(y, 0.0)
        return jax.lax.reduce_window(y, jnp.float32(-jnp.inf), jax.lax.max,
                                     (1, 1, 2, 2), (1, 1, 2, 2), "VALID")

    hh = block(x, p["conv1_w"], p["conv1_b"], p["bn1_gamma"], p["bn1_beta"],
               p["bn1_mean"], p["bn1_var"])
    hh = block(hh, p["conv2_w"], p["conv2_b"], p["bn2_gamma"], p["bn2_beta"],
               p["bn2_mean"], p["bn2_var"])
    flat = hh.reshape(hh.shape[0], -1)
    hid = flat @ p["fc1_w"].T + p["fc1_b"]
    return hid @ p["fc2_w"].T + p["fc2_b"]


def init_params(key):
    ks = jax.random.split(key, 7)
    p = {}
    p["conv1_w"] = 0.30 * jax.random.normal(ks[0], (3, 3, 2, 2), jnp.float32)
    p["conv1_b"] = 0.10 * jax.random.normal(ks[1], (3,), jnp.float32)
    p["bn1_gamma"] = 1.0 + 0.10 * jnp.arange(3, dtype=jnp.float32)
    p["bn1_beta"] = 0.05 * jnp.arange(3, dtype=jnp.float32)
    p["bn1_mean"] = 0.02 * jnp.arange(3, dtype=jnp.float32)
    p["bn1_var"] = 1.0 + 0.25 * jnp.arange(3, dtype=jnp.float32)
    p["conv2_w"] = 0.30 * jax.random.normal(ks[2], (1, 3, 2, 2), jnp.float32)
    p["conv2_b"] = jnp.array([0.05], jnp.float32)
    p["bn2_gamma"] = jnp.array([1.10], jnp.float32)
    p["bn2_beta"] = jnp.array([0.03], jnp.float32)
    p["bn2_mean"] = jnp.array([0.02], jnp.float32)
    p["bn2_var"] = jnp.array([1.30], jnp.float32)
    p["fc1_w"] = 0.15 * jax.random.normal(ks[3], (25, 49), jnp.float32)
    p["fc1_b"] = 0.05 * jax.random.normal(ks[4], (25,), jnp.float32)
    p["fc2_w"] = 0.20 * jax.random.normal(ks[5], (10, 25), jnp.float32)
    p["fc2_b"] = 0.05 * jax.random.normal(ks[6], (10,), jnp.float32)
    return p


if __name__ == "__main__":
    key = jax.random.PRNGKey(0)
    kx, kp = jax.random.split(key)
    # Input spatial size 32 is implied by the 1*7*7 flatten in the classifier.
    x = jax.random.normal(kx, (2, 3, 32, 32), jnp.float32)
    params = init_params(kp)

    out = jax.block_until_ready(net_forward(x, params))
    assert out.shape == (2, 10), out.shape
    assert out.dtype == jnp.float32
    assert bool(jnp.all(jnp.isfinite(out)))

    ref = net_reference(x, params)
    max_err = float(jnp.max(jnp.abs(out - ref)))
    assert max_err < 1e-4, f"mismatch vs reference: {max_err}"
    print("KERNEL_OK")
</pallas_src>

<mosaic_0001>
module attributes {stable_mosaic.version = 11 : i64} {
  func.func @_net_kernel(%arg0: memref<64x96xf32, #tpu.memory_space<vmem>>, %arg1: memref<12x96xf32, #tpu.memory_space<vmem>>, %arg2: memref<3xf32, #tpu.memory_space<smem>>, %arg3: memref<3x32x48xf32, #tpu.memory_space<vmem>>, %arg4: memref<32x64xf32, #tpu.memory_space<vmem>>, %arg5: memref<4x48xf32, #tpu.memory_space<vmem>>, %arg6: memref<1xf32, #tpu.memory_space<smem>>, %arg7: memref<16x8xf32, #tpu.memory_space<vmem>>, %arg8: memref<56x32xf32, #tpu.memory_space<vmem>>, %arg9: memref<7x8x25xf32, #tpu.memory_space<vmem>>, %arg10: memref<1x25xf32, #tpu.memory_space<vmem>>, %arg11: memref<25x128xf32, #tpu.memory_space<vmem>>, %arg12: memref<1x128xf32, #tpu.memory_space<vmem>>, %arg13: memref<8x128xf32, #tpu.memory_space<vmem>>) attributes {dimension_semantics = [], scalar_prefetch = 0 : i64, scratch_operands = 0 : i64, tpu.core_type = #tpu.core_type<tc>} {
    %c0 = arith.constant 0 : index
    %c0_0 = arith.constant 0 : index
    %0 = vector.load %arg0[%c0, %c0_0] : memref<64x96xf32, #tpu.memory_space<vmem>>, vector<64x96xf32>
    %c95_i32 = arith.constant 95 : i32
    %1 = tpu.dynamic_rotate %0 by %c95_i32 dim 1 : vector<64x96xf32>, i32 -> vector<64x96xf32>
    %c63_i32 = arith.constant 63 : i32
    %2 = tpu.dynamic_rotate %0 by %c63_i32 dim 0 : vector<64x96xf32>, i32 -> vector<64x96xf32>
    %c63_i32_1 = arith.constant 63 : i32
    %3 = tpu.dynamic_rotate %1 by %c63_i32_1 dim 0 : vector<64x96xf32>, i32 -> vector<64x96xf32>
    %c0_2 = arith.constant 0 : index
    %c0_3 = arith.constant 0 : index
    %4 = vector.load %arg1[%c0_2, %c0_3] : memref<12x96xf32, #tpu.memory_space<vmem>>, vector<1x96xf32>
    %5 = vector.broadcast %4 : vector<1x96xf32> to vector<64x96xf32>
    %6 = arith.mulf %0, %5 : vector<64x96xf32>
    %c1 = arith.constant 1 : index
    %c0_4 = arith.constant 0 : index
    %7 = vector.load %arg1[%c1, %c0_4] : memref<12x96xf32, #tpu.memory_space<vmem>>, vector<1x96xf32>
    %8 = vector.broadcast %7 : vector<1x96xf32> to vector<64x96xf32>
    %9 = arith.mulf %1, %8 : vector<64x96xf32>
    %10 = arith.addf %6, %9 : vector<64x96xf32>
    %c2 = arith.constant 2 : index
    %c0_5 = arith.constant 0 : index
    %11 = vector.load %arg1[%c2, %c0_5] : memref<12x96xf32, #tpu.memory_space<vmem>>, vector<1x96xf32>
    %12 = vector.broadcast %11 : vector<1x96xf32> to vector<64x96xf32>
    %13 = arith.mulf %2, %12 : vector<64x96xf32>
    %14 = arith.addf %10, %13 : vector<64x96xf32>
    %c3 = arith.constant 3 : index
    %c0_6 = arith.constant 0 : index
    %15 = vector.load %arg1[%c3, %c0_6] : memref<12x96xf32, #tpu.memory_space<vmem>>, vector<1x96xf32>
    %16 = vector.broadcast %15 : vector<1x96xf32> to vector<64x96xf32>
    %17 = arith.mulf %3, %16 : vector<64x96xf32>
    %18 = arith.addf %14, %17 : vector<64x96xf32>
    %19 = vector.extract_strided_slice %18 {offsets = [0, 0], sizes = [64, 32], strides = [1, 1]} : vector<64x96xf32> to vector<64x32xf32>
    %20 = vector.extract_strided_slice %18 {offsets = [0, 32], sizes = [64, 32], strides = [1, 1]} : vector<64x96xf32> to vector<64x32xf32>
    %21 = arith.addf %19, %20 : vector<64x32xf32>
    %22 = vector.extract_strided_slice %18 {offsets = [0, 64], sizes = [64, 32], strides = [1, 1]} : vector<64x96xf32> to vector<64x32xf32>
    %23 = arith.addf %21, %22 : vector<64x32xf32>
    %c0_7 = arith.constant 0 : index
    %24 = memref.load %arg2[%c0_7] : memref<3xf32, #tpu.memory_space<smem>>
    %25 = vector.broadcast %24 : f32 to vector<64x32xf32>
    %26 = arith.addf %23, %25 : vector<64x32xf32>
    %cst = arith.constant 0.000000e+00 : f32
    %27 = vector.broadcast %cst : f32 to vector<64x32xf32>
    %28 = arith.maximumf %26, %27 : vector<64x32xf32>
    %c31_i32 = arith.constant 31 : i32
    %29 = tpu.dynamic_rotate %28 by %c31_i32 dim 1 : vector<64x32xf32>, i32 -> vector<64x32xf32>
    %c63_i32_8 = arith.constant 63 : i32
    %30 = tpu.dynamic_rotate %28 by %c63_i32_8 dim 0 : vector<64x32xf32>, i32 -> vector<64x32xf32>
    %c63_i32_9 = arith.constant 63 : i32
    %31 = tpu.dynamic_rotate %29 by %c63_i32_9 dim 0 : vector<64x32xf32>, i32 -> vector<64x32xf32>
    %32 = arith.maximumf %28, %29 : vector<64x32xf32>
    %33 = arith.maximumf %30, %31 : vector<64x32xf32>
    %34 = arith.maximumf %32, %33 : vector<64x32xf32>
    %c0_10 = arith.constant 0 : index
    %c0_11 = arith.constant 0 : index
    %c0_12 = arith.constant 0 : index
    %35 = vector.load %arg3[%c0_10, %c0_11, %c0_12] : memref<3x32x48xf32, #tpu.memory_space<vmem>>, vector<1x32x48xf32>
    %36 = vector.shape_cast %35 : vector<1x32x48xf32> to vector<32x48xf32>
    %cst_13 = arith.constant dense<0.000000e+00> : vector<64x48xf32>
    %37 = tpu.matmul %34, %36, %cst_13 {dimension_numbers = #tpu.dot_dimension_numbers<[1], [0], [0], [1], [0, 0, 1, 1], [], []>} : vector<64x32xf32>, vector<32x48xf32>, vector<64x48xf32> -> vector<64x48xf32>
    %c4 = arith.constant 4 : index
    %c0_14 = arith.constant 0 : index
    %38 = vector.load %arg1[%c4, %c0_14] : memref<12x96xf32, #tpu.memory_space<vmem>>, vector<1x96xf32>
    %39 = vector.broadcast %38 : vector<1x96xf32> to vector<64x96xf32>
    %40 = arith.mulf %0, %39 : vector<64x96xf32>
    %c5 = arith.constant 5 : index
    %c0_15 = arith.constant 0 : index
    %41 = vector.load %arg1[%c5, %c0_15] : memref<12x96xf32, #tpu.memory_space<vmem>>, vector<1x96xf32>
    %42 = vector.broadcast %41 : vector<1x96xf32> to vector<64x96xf32>
    %43 = arith.mulf %1, %42 : vector<64x96xf32>
    %44 = arith.addf %40, %43 : vector<64x96xf32>
    %c6 = arith.constant 6 : index
    %c0_16 = arith.constant 0 : index
    %45 = vector.load %arg1[%c6, %c0_16] : memref<12x96xf32, #tpu.memory_space<vmem>>, vector<1x96xf32>
    %46 = vector.broadcast %45 : vector<1x96xf32> to vector<64x96xf32>
    %47 = arith.mulf %2, %46 : vector<64x96xf32>
    %48 = arith.addf %44, %47 : vector<64x96xf32>
    %c7 = arith.constant 7 : index
    %c0_17 = arith.constant 0 : index
    %49 = vector.load %arg1[%c7, %c0_17] : memref<12x96xf32, #tpu.memory_space<vmem>>, vector<1x96xf32>
    %50 = vector.broadcast %49 : vector<1x96xf32> to vector<64x96xf32>
    %51 = arith.mulf %3, %50 : vector<64x96xf32>
    %52 = arith.addf %48, %51 : vector<64x96xf32>
    %53 = vector.extract_strided_slice %52 {offsets = [0, 0], sizes = [64, 32], strides = [1, 1]} : vector<64x96xf32> to vector<64x32xf32>
    %54 = vector.extract_strided_slice %52 {offsets = [0, 32], sizes = [64, 32], strides = [1, 1]} : vector<64x96xf32> to vector<64x32xf32>
    %55 = arith.addf %53, %54 : vector<64x32xf32>
    %56 = vector.extract_strided_slice %52 {offsets = [0, 64], sizes = [64, 32], strides = [1, 1]} : vector<64x96xf32> to vector<64x32xf32>
    %57 = arith.addf %55, %56 : vector<64x32xf32>
    %c1_18 = arith.constant 1 : index
    %58 = memref.load %arg2[%c1_18] : memref<3xf32, #tpu.memory_space<smem>>
    %59 = vector.broadcast %58 : f32 to vector<64x32xf32>
    %60 = arith.addf %57, %59 : vector<64x32xf32>
    %cst_19 = arith.constant 0.000000e+00 : f32
    %61 = vector.broadcast %cst_19 : f32 to vector<64x32xf32>
    %62 = arith.maximumf %60, %61 : vector<64x32xf32>
    %c31_i32_20 = arith.constant 31 : i32
    %63 = tpu.dynamic_rotate %62 by %c31_i32_20 dim 1 : vector<64x32xf32>, i32 -> vector<64x32xf32>
    %c63_i32_21 = arith.constant 63 : i32
    %64 = tpu.dynamic_rotate %62 by %c63_i32_21 dim 0 : vector<64x32xf32>, i32 -> vector<64x32xf32>
    %c63_i32_22 = arith.constant 63 : i32
    %65 = tpu.dynamic_rotate %63 by %c63_i32_22 dim 0 : vector<64x32xf32>, i32 -> vector<64x32xf32>
    %66 = arith.maximumf %62, %63 : vector<64x32xf32>
    %67 = arith.maximumf %64, %65 : vector<64x32xf32>
    %68 = arith.maximumf %66, %67 : vector<64x32xf32>
    %c1_23 = arith.constant 1 : index
    %c0_24 = arith.constant 0 : index
    %c0_25 = arith.constant 0 : index
    %69 = vector.load %arg3[%c1_23, %c0_24, %c0_25] : memref<3x32x48xf32, #tpu.memory_space<vmem>>, vector<1x32x48xf32>
    %70 = vector.shape_cast %69 : vector<1x32x48xf32> to vector<32x48xf32>
    %cst_26 = arith.constant dense<0.000000e+00> : vector<64x48xf32>
    %71 = tpu.matmul %68, %70, %cst_26 {dimension_numbers = #tpu.dot_dimension_numbers<[1], [0], [0], [1], [0, 0, 1, 1], [], []>} : vector<64x32xf32>, vector<32x48xf32>, vector<64x48xf32> -> vector<64x48xf32>
    %72 = arith.addf %37, %71 : vector<64x48xf32>
    %c8 = arith.constant 8 : index
    %c0_27 = arith.constant 0 : index
    %73 = vector.load %arg1[%c8, %c0_27] : memref<12x96xf32, #tpu.memory_space<vmem>>, vector<1x96xf32>
    %74 = vector.broadcast %73 : vector<1x96xf32> to vector<64x96xf32>
    %75 = arith.mulf %0, %74 : vector<64x96xf32>
    %c9 = arith.constant 9 : index
    %c0_28 = arith.constant 0 : index
    %76 = vector.load %arg1[%c9, %c0_28] : memref<12x96xf32, #tpu.memory_space<vmem>>, vector<1x96xf32>
    %77 = vector.broadcast %76 : vector<1x96xf32> to vector<64x96xf32>
    %78 = arith.mulf %1, %77 : vector<64x96xf32>
    %79 = arith.addf %75, %78 : vector<64x96xf32>
    %c10 = arith.constant 10 : index
    %c0_29 = arith.constant 0 : index
    %80 = vector.load %arg1[%c10, %c0_29] : memref<12x96xf32, #tpu.memory_space<vmem>>, vector<1x96xf32>
    %81 = vector.broadcast %80 : vector<1x96xf32> to vector<64x96xf32>
    %82 = arith.mulf %2, %81 : vector<64x96xf32>
    %83 = arith.addf %79, %82 : vector<64x96xf32>
    %c11 = arith.constant 11 : index
    %c0_30 = arith.constant 0 : index
    %84 = vector.load %arg1[%c11, %c0_30] : memref<12x96xf32, #tpu.memory_space<vmem>>, vector<1x96xf32>
    %85 = vector.broadcast %84 : vector<1x96xf32> to vector<64x96xf32>
    %86 = arith.mulf %3, %85 : vector<64x96xf32>
    %87 = arith.addf %83, %86 : vector<64x96xf32>
    %88 = vector.extract_strided_slice %87 {offsets = [0, 0], sizes = [64, 32], strides = [1, 1]} : vector<64x96xf32> to vector<64x32xf32>
    %89 = vector.extract_strided_slice %87 {offsets = [0, 32], sizes = [64, 32], strides = [1, 1]} : vector<64x96xf32> to vector<64x32xf32>
    %90 = arith.addf %88, %89 : vector<64x32xf32>
    %91 = vector.extract_strided_slice %87 {offsets = [0, 64], sizes = [64, 32], strides = [1, 1]} : vector<64x96xf32> to vector<64x32xf32>
    %92 = arith.addf %90, %91 : vector<64x32xf32>
    %c2_31 = arith.constant 2 : index
    %93 = memref.load %arg2[%c2_31] : memref<3xf32, #tpu.memory_space<smem>>
    %94 = vector.broadcast %93 : f32 to vector<64x32xf32>
    %95 = arith.addf %92, %94 : vector<64x32xf32>
    %cst_32 = arith.constant 0.000000e+00 : f32
    %96 = vector.broadcast %cst_32 : f32 to vector<64x32xf32>
    %97 = arith.maximumf %95, %96 : vector<64x32xf32>
    %c31_i32_33 = arith.constant 31 : i32
    %98 = tpu.dynamic_rotate %97 by %c31_i32_33 dim 1 : vector<64x32xf32>, i32 -> vector<64x32xf32>
    %c63_i32_34 = arith.constant 63 : i32
    %99 = tpu.dynamic_rotate %97 by %c63_i32_34 dim 0 : vector<64x32xf32>, i32 -> vector<64x32xf32>
    %c63_i32_35 = arith.constant 63 : i32
    %100 = tpu.dynamic_rotate %98 by %c63_i32_35 dim 0 : vector<64x32xf32>, i32 -> vector<64x32xf32>
    %101 = arith.maximumf %97, %98 : vector<64x32xf32>
    %102 = arith.maximumf %99, %100 : vector<64x32xf32>
    %103 = arith.maximumf %101, %102 : vector<64x32xf32>
    %c2_36 = arith.constant 2 : index
    %c0_37 = arith.constant 0 : index
    %c0_38 = arith.constant 0 : index
    %104 = vector.load %arg3[%c2_36, %c0_37, %c0_38] : memref<3x32x48xf32, #tpu.memory_space<vmem>>, vector<1x32x48xf32>
    %105 = vector.shape_cast %104 : vector<1x32x48xf32> to vector<32x48xf32>
    %cst_39 = arith.constant dense<0.000000e+00> : vector<64x48xf32>
    %106 = tpu.matmul %103, %105, %cst_39 {dimension_numbers = #tpu.dot_dimension_numbers<[1], [0], [0], [1], [0, 0, 1, 1], [], []>} : vector<64x32xf32>, vector<32x48xf32>, vector<64x48xf32> -> vector<64x48xf32>
    %107 = arith.addf %72, %106 : vector<64x48xf32>
    %c0_40 = arith.constant 0 : index
    %c0_41 = arith.constant 0 : index
    %108 = vector.load %arg4[%c0_40, %c0_41] : memref<32x64xf32, #tpu.memory_space<vmem>>, vector<32x64xf32>
    %cst_42 = arith.constant dense<0.000000e+00> : vector<32x48xf32>
    %109 = tpu.matmul %108, %107, %cst_42 {dimension_numbers = #tpu.dot_dimension_numbers<[1], [0], [0], [1], [0, 0, 1, 1], [], []>} : vector<32x64xf32>, vector<64x48xf32>, vector<32x48xf32> -> vector<32x48xf32>
    %c47_i32 = arith.constant 47 : i32
    %110 = tpu.dynamic_rotate %109 by %c47_i32 dim 1 : vector<32x48xf32>, i32 -> vector<32x48xf32>
    %c31_i32_43 = arith.constant 31 : i32
    %111 = tpu.dynamic_rotate %109 by %c31_i32_43 dim 0 : vector<32x48xf32>, i32 -> vector<32x48xf32>
    %c31_i32_44 = arith.constant 31 : i32
    %112 = tpu.dynamic_rotate %110 by %c31_i32_44 dim 0 : vector<32x48xf32>, i32 -> vector<32x48xf32>
    %c0_45 = arith.constant 0 : index
    %c0_46 = arith.constant 0 : index
    %113 = vector.load %arg5[%c0_45, %c0_46] : memref<4x48xf32, #tpu.memory_space<vmem>>, vector<1x48xf32>
    %114 = vector.broadcast %113 : vector<1x48xf32> to vector<32x48xf32>
    %115 = arith.mulf %109, %114 : vector<32x48xf32>
    %c1_47 = arith.constant 1 : index
    %c0_48 = arith.constant 0 : index
    %116 = vector.load %arg5[%c1_47, %c0_48] : memref<4x48xf32, #tpu.memory_space<vmem>>, vector<1x48xf32>
    %117 = vector.broadcast %116 : vector<1x48xf32> to vector<32x48xf32>
    %118 = arith.mulf %110, %117 : vector<32x48xf32>
    %119 = arith.addf %115, %118 : vector<32x48xf32>
    %c2_49 = arith.constant 2 : index
    %c0_50 = arith.constant 0 : index
    %120 = vector.load %arg5[%c2_49, %c0_50] : memref<4x48xf32, #tpu.memory_space<vmem>>, vector<1x48xf32>
    %121 = vector.broadcast %120 : vector<1x48xf32> to vector<32x48xf32>
    %122 = arith.mulf %111, %121 : vector<32x48xf32>
    %123 = arith.addf %119, %122 : vector<32x48xf32>
    %c3_51 = arith.constant 3 : index
    %c0_52 = arith.constant 0 : index
    %124 = vector.load %arg5[%c3_51, %c0_52] : memref<4x48xf32, #tpu.memory_space<vmem>>, vector<1x48xf32>
    %125 = vector.broadcast %124 : vector<1x48xf32> to vector<32x48xf32>
    %126 = arith.mulf %112, %125 : vector<32x48xf32>
    %127 = arith.addf %123, %126 : vector<32x48xf32>
    %128 = vector.extract_strided_slice %127 {offsets = [0, 0], sizes = [32, 16], strides = [1, 1]} : vector<32x48xf32> to vector<32x16xf32>
    %129 = vector.extract_strided_slice %127 {offsets = [0, 16], sizes = [32, 16], strides = [1, 1]} : vector<32x48xf32> to vector<32x16xf32>
    %130 = arith.addf %128, %129 : vector<32x16xf32>
    %131 = vector.extract_strided_slice %127 {offsets = [0, 32], sizes = [32, 16], strides = [1, 1]} : vector<32x48xf32> to vector<32x16xf32>
    %132 = arith.addf %130, %131 : vector<32x16xf32>
    %c0_53 = arith.constant 0 : index
    %133 = memref.load %arg6[%c0_53] : memref<1xf32, #tpu.memory_space<smem>>
    %134 = vector.broadcast %133 : f32 to vector<32x16xf32>
    %135 = arith.addf %132, %134 : vector<32x16xf32>
    %cst_54 = arith.constant 0.000000e+00 : f32
    %136 = vector.broadcast %cst_54 : f32 to vector<32x16xf32>
    %137 = arith.maximumf %135, %136 : vector<32x16xf32>
    %c15_i32 = arith.constant 15 : i32
    %138 = tpu.dynamic_rotate %137 by %c15_i32 dim 1 : vector<32x16xf32>, i32 -> vector<32x16xf32>
    %c31_i32_55 = arith.constant 31 : i32
    %139 = tpu.dynamic_rotate %137 by %c31_i32_55 dim 0 : vector<32x16xf32>, i32 -> vector<32x16xf32>
    %c31_i32_56 = arith.constant 31 : i32
    %140 = tpu.dynamic_rotate %138 by %c31_i32_56 dim 0 : vector<32x16xf32>, i32 -> vector<32x16xf32>
    %141 = arith.maximumf %137, %138 : vector<32x16xf32>
    %142 = arith.maximumf %139, %140 : vector<32x16xf32>
    %143 = arith.maximumf %141, %142 : vector<32x16xf32>
    %c0_57 = arith.constant 0 : index
    %c0_58 = arith.constant 0 : index
    %144 = vector.load %arg7[%c0_57, %c0_58] : memref<16x8xf32, #tpu.memory_space<vmem>>, vector<16x8xf32>
    %cst_59 = arith.constant dense<0.000000e+00> : vector<32x8xf32>
    %145 = tpu.matmul %143, %144, %cst_59 {dimension_numbers = #tpu.dot_dimension_numbers<[1], [0], [0], [1], [0, 0, 1, 1], [], []>} : vector<32x16xf32>, vector<16x8xf32>, vector<32x8xf32> -> vector<32x8xf32>
    %c0_60 = arith.constant 0 : index
    %c0_61 = arith.constant 0 : index
    %146 = vector.load %arg8[%c0_60, %c0_61] : memref<56x32xf32, #tpu.memory_space<vmem>>, vector<56x32xf32>
    %cst_62 = arith.constant dense<0.000000e+00> : vector<56x8xf32>
    %147 = tpu.matmul %146, %145, %cst_62 {dimension_numbers = #tpu.dot_dimension_numbers<[1], [0], [0], [1], [0, 0, 1, 1], [], []>} : vector<56x32xf32>, vector<32x8xf32>, vector<56x8xf32> -> vector<56x8xf32>
    %148 = vector.extract_strided_slice %147 {offsets = [0, 0], sizes = [8, 8], strides = [1, 1]} : vector<56x8xf32> to vector<8x8xf32>
    %c0_63 = arith.constant 0 : index
    %c0_64 = arith.constant 0 : index
    %c0_65 = arith.constant 0 : index
    %149 = vector.load %arg9[%c0_63, %c0_64, %c0_65] : memref<7x8x25xf32, #tpu.memory_space<vmem>>, vector<1x8x25xf32>
    %150 = vector.shape_cast %149 : vector<1x8x25xf32> to vector<8x25xf32>
    %cst_66 = arith.constant dense<0.000000e+00> : vector<8x25xf32>
    %151 = tpu.matmul %148, %150, %cst_66 {dimension_numbers = #tpu.dot_dimension_numbers<[1], [0], [0], [1], [0, 0, 1, 1], [], []>} : vector<8x8xf32>, vector<8x25xf32>, vector<8x25xf32> -> vector<8x25xf32>
    %152 = vector.extract_strided_slice %147 {offsets = [8, 0], sizes = [8, 8], strides = [1, 1]} : vector<56x8xf32> to vector<8x8xf32>
    %c1_67 = arith.constant 1 : index
    %c0_68 = arith.constant 0 : index
    %c0_69 = arith.constant 0 : index
    %153 = vector.load %arg9[%c1_67, %c0_68, %c0_69] : memref<7x8x25xf32, #tpu.memory_space<vmem>>, vector<1x8x25xf32>
    %154 = vector.shape_cast %153 : vector<1x8x25xf32> to vector<8x25xf32>
    %cst_70 = arith.constant dense<0.000000e+00> : vector<8x25xf32>
    %155 = tpu.matmul %152, %154, %cst_70 {dimension_numbers = #tpu.dot_dimension_numbers<[1], [0], [0], [1], [0, 0, 1, 1], [], []>} : vector<8x8xf32>, vector<8x25xf32>, vector<8x25xf32> -> vector<8x25xf32>
    %156 = arith.addf %151, %155 : vector<8x25xf32>
    %157 = vector.extract_strided_slice %147 {offsets = [16, 0], sizes = [8, 8], strides = [1, 1]} : vector<56x8xf32> to vector<8x8xf32>
    %c2_71 = arith.constant 2 : index
    %c0_72 = arith.constant 0 : index
    %c0_73 = arith.constant 0 : index
    %158 = vector.load %arg9[%c2_71, %c0_72, %c0_73] : memref<7x8x25xf32, #tpu.memory_space<vmem>>, vector<1x8x25xf32>
    %159 = vector.shape_cast %158 : vector<1x8x25xf32> to vector<8x25xf32>
    %cst_74 = arith.constant dense<0.000000e+00> : vector<8x25xf32>
    %160 = tpu.matmul %157, %159, %cst_74 {dimension_numbers = #tpu.dot_dimension_numbers<[1], [0], [0], [1], [0, 0, 1, 1], [], []>} : vector<8x8xf32>, vector<8x25xf32>, vector<8x25xf32> -> vector<8x25xf32>
    %161 = arith.addf %156, %160 : vector<8x25xf32>
    %162 = vector.extract_strided_slice %147 {offsets = [24, 0], sizes = [8, 8], strides = [1, 1]} : vector<56x8xf32> to vector<8x8xf32>
    %c3_75 = arith.constant 3 : index
    %c0_76 = arith.constant 0 : index
    %c0_77 = arith.constant 0 : index
    %163 = vector.load %arg9[%c3_75, %c0_76, %c0_77] : memref<7x8x25xf32, #tpu.memory_space<vmem>>, vector<1x8x25xf32>
    %164 = vector.shape_cast %163 : vector<1x8x25xf32> to vector<8x25xf32>
    %cst_78 = arith.constant dense<0.000000e+00> : vector<8x25xf32>
    %165 = tpu.matmul %162, %164, %cst_78 {dimension_numbers = #tpu.dot_dimension_numbers<[1], [0], [0], [1], [0, 0, 1, 1], [], []>} : vector<8x8xf32>, vector<8x25xf32>, vector<8x25xf32> -> vector<8x25xf32>
    %166 = arith.addf %161, %165 : vector<8x25xf32>
    %167 = vector.extract_strided_slice %147 {offsets = [32, 0], sizes = [8, 8], strides = [1, 1]} : vector<56x8xf32> to vector<8x8xf32>
    %c4_79 = arith.constant 4 : index
    %c0_80 = arith.constant 0 : index
    %c0_81 = arith.constant 0 : index
    %168 = vector.load %arg9[%c4_79, %c0_80, %c0_81] : memref<7x8x25xf32, #tpu.memory_space<vmem>>, vector<1x8x25xf32>
    %169 = vector.shape_cast %168 : vector<1x8x25xf32> to vector<8x25xf32>
    %cst_82 = arith.constant dense<0.000000e+00> : vector<8x25xf32>
    %170 = tpu.matmul %167, %169, %cst_82 {dimension_numbers = #tpu.dot_dimension_numbers<[1], [0], [0], [1], [0, 0, 1, 1], [], []>} : vector<8x8xf32>, vector<8x25xf32>, vector<8x25xf32> -> vector<8x25xf32>
    %171 = arith.addf %166, %170 : vector<8x25xf32>
    %172 = vector.extract_strided_slice %147 {offsets = [40, 0], sizes = [8, 8], strides = [1, 1]} : vector<56x8xf32> to vector<8x8xf32>
    %c5_83 = arith.constant 5 : index
    %c0_84 = arith.constant 0 : index
    %c0_85 = arith.constant 0 : index
    %173 = vector.load %arg9[%c5_83, %c0_84, %c0_85] : memref<7x8x25xf32, #tpu.memory_space<vmem>>, vector<1x8x25xf32>
    %174 = vector.shape_cast %173 : vector<1x8x25xf32> to vector<8x25xf32>
    %cst_86 = arith.constant dense<0.000000e+00> : vector<8x25xf32>
    %175 = tpu.matmul %172, %174, %cst_86 {dimension_numbers = #tpu.dot_dimension_numbers<[1], [0], [0], [1], [0, 0, 1, 1], [], []>} : vector<8x8xf32>, vector<8x25xf32>, vector<8x25xf32> -> vector<8x25xf32>
    %176 = arith.addf %171, %175 : vector<8x25xf32>
    %177 = vector.extract_strided_slice %147 {offsets = [48, 0], sizes = [8, 8], strides = [1, 1]} : vector<56x8xf32> to vector<8x8xf32>
    %c6_87 = arith.constant 6 : index
    %c0_88 = arith.constant 0 : index
    %c0_89 = arith.constant 0 : index
    %178 = vector.load %arg9[%c6_87, %c0_88, %c0_89] : memref<7x8x25xf32, #tpu.memory_space<vmem>>, vector<1x8x25xf32>
    %179 = vector.shape_cast %178 : vector<1x8x25xf32> to vector<8x25xf32>
    %cst_90 = arith.constant dense<0.000000e+00> : vector<8x25xf32>
    %180 = tpu.matmul %177, %179, %cst_90 {dimension_numbers = #tpu.dot_dimension_numbers<[1], [0], [0], [1], [0, 0, 1, 1], [], []>} : vector<8x8xf32>, vector<8x25xf32>, vector<8x25xf32> -> vector<8x25xf32>
    %181 = arith.addf %176, %180 : vector<8x25xf32>
    %c0_91 = arith.constant 0 : index
    %c0_92 = arith.constant 0 : index
    %182 = vector.load %arg10[%c0_91, %c0_92] : memref<1x25xf32, #tpu.memory_space<vmem>>, vector<1x25xf32>
    %183 = vector.broadcast %182 : vector<1x25xf32> to vector<8x25xf32>
    %184 = arith.addf %181, %183 : vector<8x25xf32>
    %c0_93 = arith.constant 0 : index
    %c0_94 = arith.constant 0 : index
    %185 = vector.load %arg11[%c0_93, %c0_94] : memref<25x128xf32, #tpu.memory_space<vmem>>, vector<25x128xf32>
    %cst_95 = arith.constant dense<0.000000e+00> : vector<8x128xf32>
    %186 = tpu.matmul %184, %185, %cst_95 {dimension_numbers = #tpu.dot_dimension_numbers<[1], [0], [0], [1], [0, 0, 1, 1], [], []>} : vector<8x25xf32>, vector<25x128xf32>, vector<8x128xf32> -> vector<8x128xf32>
    %c0_96 = arith.constant 0 : index
    %c0_97 = arith.constant 0 : index
    %187 = vector.load %arg12[%c0_96, %c0_97] : memref<1x128xf32, #tpu.memory_space<vmem>>, vector<1x128xf32>
    %188 = vector.broadcast %187 : vector<1x128xf32> to vector<8x128xf32>
    %189 = arith.addf %186, %188 : vector<8x128xf32>
    %c0_98 = arith.constant 0 : index
    %c0_99 = arith.constant 0 : index
    %190 = vector.load %arg13[%c0_98, %c0_99] : memref<8x128xf32, #tpu.memory_space<vmem>>, vector<8x128xf32>
    tpu.vector_store %arg13[%c0_98, %c0_99], %189 {strides = array<i32>} : memref<8x128xf32, #tpu.memory_space<vmem>>, vector<8x128xf32>,
    return
  }
}

</mosaic_0001>

<bundles_post_ra>
// kernel: net_forward.1
= control target key start
LH: loop header
LB: loop body
LE: loop exit
PB: predicated region body
PF: predicated region fallthrough
CT: control target
= control target key end

     0   :  { %19 = vsyncpa [#allocation4], 0  ;;  %s4699_s0 = inlined_call_operand.vmem [shape: f32[64,96], index: 0, kind: input, shape index: {}]   ;;  %s4700_s1 = inlined_call_operand.vmem [shape: f32[12,96], index: 1, kind: input, shape index: {}]   ;;  %s4701_s2 = inlined_call_operand.vmem [shape: f32[3], index: 2, kind: input, shape index: {}]   ;;  %s4702_s3 = inlined_call_operand.vmem [shape: f32[3,32,48], index: 3, kind: input, shape index: {}]   ;;  %s4703_s4 = inlined_call_operand.vmem [shape: f32[32,64], index: 4, kind: input, shape index: {}]   ;;  %s4704_s5 = inlined_call_operand.vmem [shape: f32[4,48], index: 5, kind: input, shape index: {}]   ;;  %s4705_s6 = inlined_call_operand.<no memory space> [shape: f32[1], index: 6, kind: input, shape index: {}]   ;;  %s4706_s7 = inlined_call_operand.vmem [shape: f32[16,8], index: 7, kind: input, shape index: {}]   ;;  %s4707_s8 = inlined_call_operand.vmem [shape: f32[56,32], index: 8, kind: input, shape index: {}]   ;;  %s4708_s9 = inlined_call_operand.vmem [shape: f32[7,8,25], index: 9, kind: input, shape index: {}]   ;;  %s4709_s10 = inlined_call_operand.vmem [shape: f32[1,25], index: 10, kind: input, shape index: {}]   ;;  %s4710_s11 = inlined_call_operand.vmem [shape: f32[25,128], index: 11, kind: input, shape index: {}]   ;;  %s4711_s12 = inlined_call_operand.vmem [shape: f32[1,128], index: 12, kind: input, shape index: {}]   ;;  %s4712_s13 = inlined_call_operand.vmem [shape: f32[8,128], index: 13, kind: output, shape index: {}]  }
   0x1   :  { %s30_s27 = sshll.u32 %s4701_s2, 4  ;;  %s31_s27 = int_to_ptr.vmem [resolvable:$true] %s30_s27 }
   0x2   :  { %s3229_s28 = scalar_lea.vmem %s31_s27, 16  ;;  %p3234_p1 = scmp.lt.s32.totalorder %s31_s27, %s31_s27 }
   0x3   :  { %p3230_p0 = scmp.ne.s32.totalorder %s31_s27, %s3229_s28  ;;  %p3235_p2 = scmp.lt.s32.totalorder %s3229_s28, %s3229_s28 }
   0x5   :  { %p3236_p3 = por %p3235_p2, %p3234_p1 }
   0x7   :  { %p3237_p4 = pnand %p3236_p3, %p3230_p0 }
   0x9   :  { %3240 = shalt.err (!%p3237_p4)
}
   0xa   :  { %s3243_s29 = smov [#allocation3]  }
   0xb   :  { %33 = dma.vmem_to_smem %s31_s27, 16, %s3243_s29, [#allocation4]  }
   0xc   :  { %3241 = dma.done.wait [#allocation4], 16  }
   0xd   :  { %3242 = vsyncadd [#allocation4], 4294967280 }
   0xe   :  { %57 = sfence }
   0xf   :  { %v3332_v0 = vld [vmem:[%s4699_s0] sm:$0xff]  ;;  %v3337_v1 = vld [vmem:[%s4699_s0 + $0x10] sm:$0xff]  ;;  %s3244_s16 = smov 96   ;;  %v3346_v2 = vld [vmem:[%s4699_s0 + $0x8] sm:$0xff]  ;;  %s3245_s14 = smov 1   ;;  %vm66_vm0 = vcmask 1048320  }
  0x10   :  { %67 = vrot.lane.b32.xlu0 %v3332_v0, %s3244_s16  ;;  %73 = vrot.lane.b32.xlu1 %v3337_v1, %s3244_s16  ;;  %v3351_v3 = vld [vmem:[%s4699_s0 + $0x18] sm:$0xff]  ;;  %v3360_v4 = vld [vmem:[%s4699_s0 + $0x28] sm:$0xff]  ;;  %s3246_s18 = smov 127   ;;  %s3247_s25 = smov 64   ;;  %vm384_vm2 = vcmask 1047808   ;;  %vm868_vm3 = vcmask 261120  }
  0x11   :  { %v3365_v5 = vld [vmem:[%s4699_s0 + $0x20] sm:$0xff]  ;;  %v3374_v6 = vld [vmem:[%s4699_s0 + $0x38] sm:$0xff]  ;;  %v3379_v7 = vld [vmem:[%s4699_s0 + $0x30] sm:$0xff]  ;;  %s3248_s22 = smov 32   ;;  %s366_s23 = sld [smem:[#allocation3]]  ;;  %vm1611_vm4 = vcmask 523264  }
  0x12   :  { %v2815_v8 = vld [vmem:[%s4700_s1 + $0x5] ss:$0 sm:$0xff]  ;;  %v2811_v17 = vld [vmem:[%s4700_s1 + $0x1] ss:$0 sm:$0xff]  ;;  %v2840_v26 = vld [vmem:[%s4700_s1 + $0x9] ss:$0 sm:$0xff] }
  0x13   :  { %s2843_s24 = sld [smem:[#allocation3 + $0x2]]  ;;  %vm1709_vm5 = vcmask 1047936   ;;  %s3251_s0 = smov 16   ;;  %vm1880_vm6 = vcmask 1047680   ;;  %vm1951_vm7 = vcmask 130048   ;;  %vm3253_vm8 = vmmov 0  }
  0x14   :  { %70 = vrot.lane.b32.xlu0 %v3346_v2, %s3244_s16  ;;  %76 = vrot.lane.b32.xlu1 %v3351_v3, %s3244_s16  ;;  %vm2180_vm9 = vcmask 64512   ;;  %vm2730_vm10 = vcmask 1040384   ;;  %vm3255_vm11 = vmmov 1   ;;  %vm2726_vm13 = vcmask 203776  }
  0x15   :  { %vm3198_vm12 = vmpackc.low %vm2730_vm10, %vm3255_vm11 }
  0x18   :  { %82 = vrot.lane.b32.xlu1 %v3360_v4, %s3244_s16  ;;  %79 = vrot.lane.b32.xlu0 %v3365_v5, %s3244_s16 }
  0x1c   :  { %88 = vrot.lane.b32.xlu1 %v3374_v6, %s3244_s16  ;;  %85 = vrot.lane.b32.xlu0 %v3379_v7, %s3244_s16 }
  0x20   :  { %544 = vrot.lane.b32.xlu1 %v2815_v8, %s3245_s14 }
  0x82   :  { %v68_v9 = vpop.permute.xlu0 %67  ;;  %v74_v10 = vpop.permute.xlu1 %73 }
  0x83   :  { %v69_v11 = vsel %vm66_vm0, %v68_v9, %v3332_v0  ;;  %v75_v12 = vsel %vm66_vm0, %v74_v10, %v3337_v1 }
  0x84   :  { %91 = vrot.lane.b32.xlu0 %v69_v11, %s3244_s16 }
  0x86   :  { %v71_v13 = vpop.permute.xlu0 %70  ;;  %v77_v14 = vpop.permute.xlu1 %76 }
  0x87   :  { %v72_v15 = vsel %vm66_vm0, %v71_v13, %v3346_v2  ;;  %v78_v16 = vsel %vm66_vm0, %v77_v14, %v3351_v3 }
  0x88   :  { %95 = vrot.lane.b32.xlu0 %v75_v12, %s3244_s16  ;;  %93 = vrot.lane.b32.xlu1 %v72_v15, %s3244_s16 }
  0x8a   :  { %v83_v18 = vpop.permute.xlu1 %82  ;;  %v80_v19 = vpop.permute.xlu0 %79 }
  0x8b   :  { %v84_v20 = vsel %vm66_vm0, %v83_v18, %v3360_v4  ;;  %v81_v21 = vsel %vm66_vm0, %v80_v19, %v3365_v5 }
  0x8c   :  { %97 = vrot.lane.b32.xlu0 %v78_v16, %s3244_s16  ;;  %201 = vrot.lane.b32.xlu1 %v2811_v17, %s3245_s14  ;;  %v123_v16 = vlaneseq }
  0x8e   :  { %v89_v22 = vpop.permute.xlu1 %88  ;;  %v86_v23 = vpop.permute.xlu0 %85  ;;  %v3473_v19 = vshrl.u32 %v123_v16, 7 }
  0x8f   :  { %v90_v24 = vsel %vm66_vm0, %v89_v22, %v3374_v6  ;;  %v87_v25 = vsel %vm66_vm0, %v86_v23, %v3379_v7  ;;  %v116_v22 = vrot.slane %v3346_v2, 1  ;;  %v115_v23 = vrot.slane %v3332_v0, 1 }
  0x90   :  { %101 = vrot.lane.b32.xlu0 %v84_v20, %s3244_s16  ;;  %99 = vrot.lane.b32.xlu1 %v81_v21, %s3244_s16  ;;  %4717 = vst [vmem:[#allocation6_spill] sm:$0xff] %v3473_v19  ;;  %vm125_vm1 = vcmp.lt.s32.totalorder %v3473_v19, 7 }
  0x92   :  { %v545_v27 = vpop.permute.xlu1 %544 }
  0x94   :  { %105 = vrot.lane.b32.xlu0 %v90_v24, %s3244_s16  ;;  %103 = vrot.lane.b32.xlu1 %v87_v25, %s3244_s16  ;;  %v117_v24 = vrot.slane %v3337_v1, 1  ;;  %v3485_v25 = vld [vmem:[%s4700_s1 + $0x4] ss:$0 sm:$0xff] }
  0x98   :  { %1146 = vrot.lane.b32.xlu0 %v2840_v26, %s3245_s14  ;;  %v118_v26 = vrot.slane %v3351_v3, 1 }
  0xf6   :  { %v92_v28 = vpop.permute.xlu0 %91 }
  0xf7   :  { %v107_v29 = vsel %vm66_vm0, %v92_v28, %v3332_v0 }
  0xf8   :  { %142 = vrot.lane.b32.xlu1 %v107_v29, %s3246_s18  ;;  %v547_v46 = vmul.f32 %v545_v27, %v107_v29 }
  0xfa   :  { %v94_v30 = vpop.permute.xlu1 %93  ;;  %v96_v31 = vpop.permute.xlu0 %95 }
  0xfb   :  { %v108_v32 = vsel %vm66_vm0, %v94_v30, %v3346_v2  ;;  %v109_v33 = vsel %vm66_vm0, %v96_v31, %v3337_v1  ;;  %v3496_v31 = vld [vmem:[%s4700_s1 + $0x6] ss:$0 sm:$0xff] }
  0xfc   :  { %144 = vrot.lane.b32.xlu0 %v108_v32, %s3246_s18  ;;  %146 = vrot.lane.b32.xlu1 %v109_v33, %s3246_s18  ;;  %v548_v45 = vmul.f32 %v545_v27, %v108_v32  ;;  %v549_v48 = vmul.f32 %v545_v27, %v109_v33 }
  0xfe   :  { %v202_v34 = vpop.permute.xlu1 %201  ;;  %v98_v35 = vpop.permute.xlu0 %97 }
  0xff   :  { %v110_v36 = vsel %vm66_vm0, %v98_v35, %v3351_v3  ;;  %v204_v53 = vmul.f32 %v202_v34, %v107_v29  ;;  %v205_v54 = vmul.f32 %v202_v34, %v108_v32  ;;  %v206_v55 = vmul.f32 %v202_v34, %v109_v33 }
 0x100   :  { %148 = vrot.lane.b32.xlu0 %v110_v36, %s3246_s18  ;;  %v550_v47 = vmul.f32 %v545_v27, %v110_v36  ;;  %v207_v56 = vmul.f32 %v202_v34, %v110_v36  ;;  %v531_v35 = vmul.f32 %v3485_v25, %v3346_v2 }
 0x102   :  { %v100_v37 = vpop.permute.xlu1 %99  ;;  %v102_v38 = vpop.permute.xlu0 %101 }
 0x103   :  { %v111_v39 = vsel %vm66_vm0, %v100_v37, %v3365_v5  ;;  %v112_v40 = vsel %vm66_vm0, %v102_v38, %v3360_v4 }
 0x104   :  { %150 = vrot.lane.b32.xlu0 %v111_v39, %s3246_s18  ;;  %152 = vrot.lane.b32.xlu1 %v112_v40, %s3246_s18  ;;  %v552_v49 = vmul.f32 %v545_v27, %v112_v40  ;;  %v551_v50 = vmul.f32 %v545_v27, %v111_v39  ;;  %v208_v57 = vmul.f32 %v202_v34, %v111_v39 }
 0x105   :  { %v209_v58 = vmul.f32 %v202_v34, %v112_v40 }
 0x106   :  { %v104_v41 = vpop.permute.xlu1 %103  ;;  %v106_v42 = vpop.permute.xlu0 %105 }
 0x107   :  { %v113_v43 = vsel %vm66_vm0, %v104_v41, %v3379_v7  ;;  %v114_v44 = vsel %vm66_vm0, %v106_v42, %v3374_v6 }
 0x108   :  { %154 = vrot.lane.b32.xlu0 %v113_v43, %s3246_s18  ;;  %156 = vrot.lane.b32.xlu1 %v114_v44, %s3246_s18  ;;  %v553_v51 = vmul.f32 %v545_v27, %v113_v43  ;;  %v554_v52 = vmul.f32 %v545_v27, %v114_v44  ;;  %v210_v59 = vmul.f32 %v202_v34, %v113_v43 }
 0x109   :  { %v211_v60 = vmul.f32 %v202_v34, %v114_v44  ;;  %v530_v34 = vmul.f32 %v3485_v25, %v3332_v0 }
 0x10a   :  { %v1147_v61 = vpop.permute.xlu0 %1146 }
 0x10b   :  { %v1150_v62 = vmul.f32 %v1147_v61, %v108_v32  ;;  %v1149_v63 = vmul.f32 %v1147_v61, %v107_v29  ;;  %v1152_v8 = vmul.f32 %v1147_v61, %v110_v36  ;;  %v1151_v9 = vmul.f32 %v1147_v61, %v109_v33 }
 0x10c   :  { %565 = vrot.lane.b32.xlu0 %v548_v45, %s3246_s18  ;;  %563 = vrot.lane.b32.xlu1 %v547_v46, %s3246_s18  ;;  %v1154_v10 = vmul.f32 %v1147_v61, %v112_v40  ;;  %v1153_v11 = vmul.f32 %v1147_v61, %v111_v39  ;;  %v1156_v12 = vmul.f32 %v1147_v61, %v114_v44  ;;  %v119_v45 = vrot.slane %v3365_v5, 1  ;;  %v3536_v46 = vld [vmem:[%s4700_s1 + $0x7] ss:$0 sm:$0xff] }
 0x10d   :  { %v1155_v13 = vmul.f32 %v1147_v61, %v113_v43  ;;  %v3502_v32 = vsel %vm125_vm1, %v115_v23, %v116_v22  ;;  %v3506_v33 = vsel %vm125_vm1, %v116_v22, %v117_v24  ;;  %v3519_v39 = vsel %vm125_vm1, %v117_v24, %v118_v26 }
 0x10e   :  { %v600_v37 = vmul.f32 %v3496_v31, %v3502_v32  ;;  %v601_v38 = vmul.f32 %v3496_v31, %v3506_v33  ;;  %v534_v61 = vmul.f32 %v3485_v25, %v3365_v5 }
 0x110   :  { %569 = vrot.lane.b32.xlu0 %v550_v47, %s3246_s18  ;;  %567 = vrot.lane.b32.xlu1 %v549_v48, %s3246_s18 }
 0x114   :  { %573 = vrot.lane.b32.xlu0 %v552_v49, %s3246_s18  ;;  %571 = vrot.lane.b32.xlu1 %v551_v50, %s3246_s18  ;;  %v532_v49 = vmul.f32 %v3485_v25, %v3337_v1  ;;  %v120_v50 = vrot.slane %v3360_v4, 1 }
 0x118   :  { %575 = vrot.lane.b32.xlu1 %v553_v51, %s3246_s18  ;;  %577 = vrot.lane.b32.xlu0 %v554_v52, %s3246_s18  ;;  %v602_v51 = vmul.f32 %v3496_v31, %v3519_v39 }
 0x11c   :  { %220 = vrot.lane.b32.xlu1 %v204_v53, %s3246_s18  ;;  %222 = vrot.lane.b32.xlu0 %v205_v54, %s3246_s18 }
 0x120   :  { %224 = vrot.lane.b32.xlu1 %v206_v55, %s3246_s18  ;;  %226 = vrot.lane.b32.xlu0 %v207_v56, %s3246_s18 }
 0x124   :  { %228 = vrot.lane.b32.xlu1 %v208_v57, %s3246_s18  ;;  %230 = vrot.lane.b32.xlu0 %v209_v58, %s3246_s18  ;;  %v3553_v58 = vsel %vm125_vm1, %v118_v26, %v119_v45 }
 0x128   :  { %232 = vrot.lane.b32.xlu1 %v210_v59, %s3246_s18  ;;  %234 = vrot.lane.b32.xlu0 %v211_v60, %s3246_s18  ;;  %v533_v59 = vmul.f32 %v3485_v25, %v3351_v3 }
 0x12c   :  { %1167 = vrot.lane.b32.xlu0 %v1150_v62, %s3246_s18  ;;  %1165 = vrot.lane.b32.xlu1 %v1149_v63, %s3246_s18 }
 0x130   :  { %1171 = vrot.lane.b32.xlu0 %v1152_v8, %s3246_s18  ;;  %1169 = vrot.lane.b32.xlu1 %v1151_v9, %s3246_s18  ;;  %v3565_v9 = vsel %vm125_vm1, %v119_v45, %v120_v50 }
 0x131   :  { %v604_v16 = vmul.f32 %v3496_v31, %v3565_v9 }
 0x134   :  { %1175 = vrot.lane.b32.xlu0 %v1154_v10, %s3246_s18  ;;  %1173 = vrot.lane.b32.xlu1 %v1153_v11, %s3246_s18  ;;  %v603_v11 = vmul.f32 %v3496_v31, %v3553_v58 }
 0x138   :  { %1179 = vrot.lane.b32.xlu0 %v1156_v12, %s3246_s18  ;;  %1177 = vrot.lane.b32.xlu1 %v1155_v13, %s3246_s18 }
 0x16a   :  { %v3469_v14 = vpop.permute.xlu1 %142 }
 0x16b   :  { %v166_v36 = vrot.slane %v3469_v14, 1 }
 0x16e   :  { %v145_v15 = vpop.permute.xlu0 %144  ;;  %v147_v17 = vpop.permute.xlu1 %146 }
 0x16f   :  { %v168_v27 = vrot.slane %v147_v17, 1  ;;  %v167_v28 = vrot.slane %v145_v15, 1 }
 0x171   :  { %v3523_v40 = vsel %vm125_vm1, %v167_v28, %v168_v27  ;;  %v3529_v41 = vsel %vm125_vm1, %v166_v36, %v167_v28  ;;  %v122_v28 = vrot.slane %v3374_v6, 1 }
 0x172   :  { %v3471_v18 = vpop.permute.xlu0 %148  ;;  %v622_v54 = vmul.f32 %v3536_v46, %v3523_v40  ;;  %v621_v55 = vmul.f32 %v3536_v46, %v3529_v41 }
 0x173   :  { %v169_v42 = vrot.slane %v3471_v18, 1  ;;  %v121_v18 = vrot.slane %v3379_v7, 1 }
 0x175   :  { %v3549_v56 = vsel %vm125_vm1, %v168_v27, %v169_v42  ;;  %v3603_v45 = vsel %vm125_vm1, %v121_v18, %v122_v28 }
 0x176   :  { %v3475_v20 = vpop.permute.xlu1 %152  ;;  %v3477_v21 = vpop.permute.xlu0 %150  ;;  %v623_v12 = vmul.f32 %v3536_v46, %v3549_v56 }
 0x177   :  { %v171_v13 = vrot.slane %v3475_v20, 1  ;;  %v170_v15 = vrot.slane %v3477_v21, 1 }
 0x179   :  { %v3589_v20 = vsel %vm125_vm1, %v170_v15, %v171_v13  ;;  %v3593_v21 = vsel %vm125_vm1, %v169_v42, %v170_v15  ;;  %v3644_v15 = vld [vmem:[%s4700_s1] ss:$0 sm:$0xff] }
 0x17a   :  { %v3489_v29 = vpop.permute.xlu1 %156  ;;  %v3491_v30 = vpop.permute.xlu0 %154  ;;  %v625_v42 = vmul.f32 %v3536_v46, %v3589_v20 }
 0x17e   :  { %v564_v43 = vpop.permute.xlu1 %563  ;;  %v566_v44 = vpop.permute.xlu0 %565 }
 0x17f   :  { %v587_v47 = vadd.f32 %v564_v43, %v530_v34  ;;  %v588_v48 = vadd.f32 %v566_v44, %v531_v35  ;;  %v3597_v34 = vsel %vm125_vm1, %v120_v50, %v121_v18  ;;  %v535_v35 = vmul.f32 %v3485_v25, %v3360_v4 }
 0x180   :  { %v172_v50 = vrot.slane %v3491_v30, 1  ;;  %v188_v18 = vmul.f32 %v3644_v15, %v3346_v2 }
 0x181   :  { %v608_v52 = vadd.f32 %v600_v37, %v587_v47  ;;  %v609_v53 = vadd.f32 %v601_v38, %v588_v48  ;;  %v536_v47 = vmul.f32 %v3485_v25, %v3379_v7  ;;  %v624_v48 = vmul.f32 %v3536_v46, %v3593_v21 }
 0x182   :  { %v568_v57 = vpop.permute.xlu1 %567  ;;  %v570_v60 = vpop.permute.xlu0 %569  ;;  %v3635_v30 = vsel %vm125_vm1, %v171_v13, %v172_v50  ;;  %v3655_v13 = vld [vmem:[%s4700_s1 + $0x2] ss:$0 sm:$0xff] }
 0x183   :  { %v589_v62 = vadd.f32 %v568_v57, %v532_v49  ;;  %v3559_v63 = vadd.f32 %v622_v54, %v609_v53  ;;  %v3561_v8 = vadd.f32 %v621_v55, %v608_v52  ;;  %v590_v24 = vadd.f32 %v570_v60, %v533_v59 }
 0x184   :  { %v173_v49 = vrot.slane %v3489_v29, 1  ;;  %v606_v52 = vmul.f32 %v3496_v31, %v3603_v45 }
 0x185   :  { %v610_v10 = vadd.f32 %v602_v51, %v589_v62  ;;  %647 = vrot.lane.b32.xlu0 %v3559_v63, %s3244_s16  ;;  %645 = vrot.lane.b32.xlu1 %v3561_v8, %s3244_s16  ;;  %v611_v43 = vadd.f32 %v603_v11, %v590_v24  ;;  %v605_v51 = vmul.f32 %v3496_v31, %v3597_v34 }
 0x186   :  { %v572_v17 = vpop.permute.xlu1 %571  ;;  %v574_v22 = vpop.permute.xlu0 %573  ;;  %v3631_v29 = vsel %vm125_vm1, %v172_v50, %v173_v49  ;;  %v3709_v50 = vsel %vm125_vm1, %v173_v49, %v166_v36  ;;  %v3727_v49 = vmul.f32 %v3655_v13, %v3565_v9 }
 0x187   :  { %v591_v26 = vadd.f32 %v572_v17, %v534_v61  ;;  %v3580_v27 = vadd.f32 %v623_v12, %v610_v10  ;;  %v592_v55 = vadd.f32 %v574_v22, %v535_v35  ;;  %v3623_v60 = vadd.f32 %v624_v48, %v611_v43  ;;  %v3703_v48 = vld [vmem:[%s4700_s1 + $0xa] ss:$0 sm:$0xff] }
 0x188   :  { %v537_v12 = vmul.f32 %v3485_v25, %v3374_v6  ;;  %v627_v25 = vmul.f32 %v3536_v46, %v3631_v29  ;;  %v626_v17 = vmul.f32 %v3536_v46, %v3635_v30  ;;  %v257_v43 = vmul.f32 %v3655_v13, %v3502_v32 }
 0x189   :  { %677 = vrot.lane.b32.xlu0 %v3561_v8, %s3247_s25  ;;  %649 = vrot.lane.b32.xlu1 %v3580_v27, %s3244_s16  ;;  %v612_v44 = vadd.f32 %v604_v16, %v591_v26  ;;  %v613_v10 = vadd.f32 %v605_v51, %v592_v55  ;;  %v3650_v16 = vsel %vm125_vm1, %v122_v28, %v115_v23 }
 0x18a   :  { %v576_v37 = vpop.permute.xlu1 %575  ;;  %v578_v38 = vpop.permute.xlu0 %577  ;;  %v187_v23 = vmul.f32 %v3644_v15, %v3332_v0  ;;  %v607_v28 = vmul.f32 %v3496_v31, %v3650_v16  ;;  %v259_v31 = vmul.f32 %v3655_v13, %v3519_v39  ;;  %v3713_v55 = vmul.f32 %v3655_v13, %v3553_v58 }
 0x18b   :  { %v593_v57 = vadd.f32 %v576_v37, %v536_v47  ;;  %v3621_v59 = vadd.f32 %v625_v42, %v612_v44  ;;  %v594_v26 = vadd.f32 %v578_v38, %v537_v12  ;;  %v3677_v37 = vadd.f32 %v626_v17, %v613_v10  ;;  %v3686_v47 = vld [vmem:[%s4700_s1 + $0x8] ss:$0 sm:$0xff] }
 0x18c   :  { %v258_v44 = vmul.f32 %v3655_v13, %v3506_v33  ;;  %v189_v38 = vmul.f32 %v3644_v15, %v3337_v1  ;;  %v3694_v42 = vmul.f32 %v3644_v15, %v3351_v3  ;;  %v191_v12 = vmul.f32 %v3644_v15, %v3365_v5 }
 0x18d   :  { %681 = vrot.lane.b32.xlu0 %v3580_v27, %s3247_s25  ;;  %679 = vrot.lane.b32.xlu1 %v3559_v63, %s3247_s25  ;;  %v614_v11 = vadd.f32 %v606_v52, %v593_v57  ;;  %4719 = vst [vmem:[#allocation8_spill] sm:$0xff] %v3677_v37  ;;  %v1132_v14 = vmul.f32 %v3686_v47, %v3332_v0 }
 0x18e   :  { %v221_v53 = vpop.permute.xlu1 %220  ;;  %v223_v54 = vpop.permute.xlu0 %222  ;;  %v1133_v36 = vmul.f32 %v3686_v47, %v3346_v2  ;;  %v628_v0 = vmul.f32 %v3536_v46, %v3709_v50  ;;  %v1204_v2 = vmul.f32 %v3703_v48, %v3519_v39  ;;  %v1205_v39 = vmul.f32 %v3703_v48, %v3553_v58 }
 0x18f   :  { %v3675_v35 = vadd.f32 %v627_v25, %v614_v11  ;;  %v244_v51 = vadd.f32 %v221_v53, %v187_v23  ;;  %v245_v52 = vadd.f32 %v223_v54, %v188_v18  ;;  %v615_v11 = vadd.f32 %v607_v28, %v594_v26 }
 0x190   :  { %v1202_v53 = vmul.f32 %v3703_v48, %v3502_v32  ;;  %v1203_v54 = vmul.f32 %v3703_v48, %v3506_v33  ;;  %v1134_v25 = vmul.f32 %v3686_v47, %v3337_v1  ;;  %v1135_v32 = vmul.f32 %v3686_v47, %v3351_v3  ;;  %v3748_v33 = vld [vmem:[%s4700_s1 + $0x3] ss:$0 sm:$0xff]  ;;  %v3753_v1 = vld [vmem:[%s4700_s1 + $0xb] ss:$0 sm:$0xff]  ;;  %s2818_s1 = sld [smem:[#allocation3 + $0x1]] }
 0x191   :  { %653 = vrot.lane.b32.xlu0 %v3621_v59, %s3244_s16  ;;  %651 = vrot.lane.b32.xlu1 %v3623_v60, %s3244_s16  ;;  %4718 = vst [vmem:[#allocation7_spill] sm:$0xff] %v3675_v35  ;;  %v265_v17 = vadd.f32 %v257_v43, %v244_v51  ;;  %v266_v23 = vadd.f32 %v258_v44, %v245_v52 }
 0x192   :  { %v225_v61 = vpop.permute.xlu1 %224  ;;  %v3637_v62 = vpop.permute.xlu0 %226  ;;  %v3757_v19 = vadd.f32 %v628_v0, %v615_v11  ;;  %v278_v43 = vmul.f32 %v3748_v33, %v3529_v41  ;;  %v1224_v44 = vmul.f32 %v3753_v1, %v3523_v40 }
 0x193   :  { %v246_v18 = vadd.f32 %v225_v61, %v189_v38  ;;  %v1206_v61 = vmul.f32 %v3703_v48, %v3565_v9 }
 0x194   :  { %v3777_v9 = vadd.f32 %v278_v43, %v265_v17 }
 0x195   :  { %685 = vrot.lane.b32.xlu0 %v3621_v59, %s3247_s25  ;;  %683 = vrot.lane.b32.xlu1 %v3623_v60, %s3247_s25  ;;  %v267_v51 = vadd.f32 %v259_v31, %v246_v18  ;;  %v1225_v31 = vmul.f32 %v3753_v1, %v3549_v56 }
 0x196   :  { %v3669_v22 = vpop.permute.xlu1 %228  ;;  %v3671_v24 = vpop.permute.xlu0 %230 }
 0x197   :  { %v248_v18 = vadd.f32 %v3669_v22, %v191_v12  ;;  %v1227_v22 = vmul.f32 %v3753_v1, %v3589_v20 }
 0x199   :  { %657 = vrot.lane.b32.xlu0 %v3675_v35, %s3244_s16  ;;  %655 = vrot.lane.b32.xlu1 %v3677_v37, %s3244_s16 }
 0x19a   :  { %v3715_v57 = vpop.permute.xlu1 %232  ;;  %v3717_v10 = vpop.permute.xlu0 %234 }
 0x19d   :  { %689 = vrot.lane.b32.xlu0 %v3675_v35, %s3247_s25  ;;  %687 = vrot.lane.b32.xlu1 %v3677_v37, %s3247_s25  ;;  %v1136_v37 = vmul.f32 %v3686_v47, %v3365_v5  ;;  %v279_v35 = vmul.f32 %v3748_v33, %v3523_v40  ;;  %v1223_v5 = vmul.f32 %v3753_v1, %v3529_v41 }
 0x19e   :  { %v1166_v46 = vpop.permute.xlu1 %1165  ;;  %v1168_v26 = vpop.permute.xlu0 %1167  ;;  %v1137_v40 = vmul.f32 %v3686_v47, %v3360_v4  ;;  %v280_v41 = vmul.f32 %v3748_v33, %v3549_v56  ;;  %v1139_v56 = vmul.f32 %v3686_v47, %v3374_v6 }
 0x19f   :  { %v1189_v28 = vadd.f32 %v1166_v46, %v1132_v14  ;;  %v1190_v3 = vadd.f32 %v1168_v26, %v1133_v36  ;;  %v3775_v14 = vadd.f32 %v279_v35, %v266_v23  ;;  %v1207_v46 = vmul.f32 %v3703_v48, %v3597_v34 }
 0x1a0   :  { %v1138_v35 = vmul.f32 %v3686_v47, %v3379_v7 }
 0x1a1   :  { %v1210_v58 = vadd.f32 %v1202_v53, %v1189_v28  ;;  %v1211_v38 = vadd.f32 %v1203_v54, %v1190_v3  ;;  %691 = vrot.lane.b32.xlu0 %v3757_v19, %s3247_s25  ;;  %659 = vrot.lane.b32.xlu1 %v3757_v19, %s3244_s16  ;;  %v3802_v3 = vadd.f32 %v280_v41, %v267_v51 }
 0x1a2   :  { %v1170_v52 = vpop.permute.xlu1 %1169  ;;  %v1172_v11 = vpop.permute.xlu0 %1171  ;;  %v262_v41 = vmul.f32 %v3655_v13, %v3597_v34 }
 0x1a3   :  { %v1191_v36 = vadd.f32 %v1170_v52, %v1134_v25  ;;  %v1192_v53 = vadd.f32 %v1172_v11, %v1135_v32  ;;  %v3781_v54 = vadd.f32 %v1224_v44, %v1211_v38  ;;  %v3783_v0 = vadd.f32 %v1223_v5, %v1210_v58 }
 0x1a4   :  { %v1226_v25 = vmul.f32 %v3753_v1, %v3593_v21  ;;  %v247_v32 = vadd.f32 %v3637_v62, %v3694_v42  ;;  %v1208_v58 = vmul.f32 %v3703_v48, %v3603_v45  ;;  %v1209_v62 = vmul.f32 %v3703_v48, %v3650_v16 }
 0x1a5   :  { %v1212_v17 = vadd.f32 %v1204_v2, %v1191_v36  ;;  %v1213_v23 = vadd.f32 %v1205_v39, %v1192_v53  ;;  %304 = vrot.lane.b32.xlu0 %v3775_v14, %s3244_s16  ;;  %302 = vrot.lane.b32.xlu1 %v3777_v9, %s3244_s16  ;;  %v269_v38 = vadd.f32 %v3727_v49, %v248_v18 }
 0x1a6   :  { %v1174_v26 = vpop.permute.xlu1 %1173  ;;  %v1176_v28 = vpop.permute.xlu0 %1175  ;;  %v268_v47 = vadd.f32 %v3713_v55, %v247_v32  ;;  %v192_v48 = vmul.f32 %v3644_v15, %v3360_v4  ;;  %v1230_v53 = vmul.f32 %v3753_v1, %v3709_v50  ;;  %v282_v55 = vmul.f32 %v3748_v33, %v3589_v20 }
 0x1a7   :  { %v1193_v2 = vadd.f32 %v1174_v26, %v1136_v37  ;;  %v1194_v39 = vadd.f32 %v1176_v28, %v1137_v40  ;;  %v3806_v43 = vadd.f32 %v1225_v31, %v1212_v17  ;;  %v3808_v44 = vadd.f32 %v1226_v25, %v1213_v23 }
 0x1a8   :  { %v1228_v37 = vmul.f32 %v3753_v1, %v3635_v30  ;;  %v281_v4 = vmul.f32 %v3748_v33, %v3593_v21  ;;  %v263_v20 = vmul.f32 %v3655_v13, %v3603_v45  ;;  %v3854_v23 = vadd.f32 %v282_v55, %v269_v38 }
 0x1a9   :  { %v1214_v42 = vadd.f32 %v1206_v61, %v1193_v2  ;;  %v1215_v12 = vadd.f32 %v1207_v46, %v1194_v39  ;;  %334 = vrot.lane.b32.xlu0 %v3777_v9, %s3247_s25  ;;  %306 = vrot.lane.b32.xlu1 %v3802_v3, %s3244_s16  ;;  %v193_v61 = vmul.f32 %v3644_v15, %v3379_v7 }
 0x1aa   :  { %v1178_v5 = vpop.permute.xlu1 %1177  ;;  %v1180_v51 = vpop.permute.xlu0 %1179  ;;  %v1229_v7 = vmul.f32 %v3753_v1, %v3631_v29  ;;  %v3849_v21 = vadd.f32 %v281_v4, %v268_v47  ;;  %v194_v45 = vmul.f32 %v3644_v15, %v3374_v6  ;;  %v283_v1 = vmul.f32 %v3748_v33, %v3635_v30 }
 0x1ab   :  { %v1195_v52 = vadd.f32 %v1178_v5, %v1138_v35  ;;  %v1196_v11 = vadd.f32 %v1180_v51, %v1139_v56  ;;  %v3828_v40 = vadd.f32 %v1227_v22, %v1214_v42  ;;  %v3830_v36 = vadd.f32 %v1228_v37, %v1215_v12 }
 0x1ac   :  { %v249_v35 = vadd.f32 %v3671_v24, %v192_v48  ;;  %v250_v31 = vadd.f32 %v3715_v57, %v193_v61  ;;  %v284_v57 = vmul.f32 %v3748_v33, %v3631_v29  ;;  %v251_v32 = vadd.f32 %v3717_v10, %v194_v45 }
 0x1ad   :  { %v1216_v49 = vadd.f32 %v1208_v58, %v1195_v52  ;;  %v1217_v46 = vadd.f32 %v1209_v62, %v1196_v11  ;;  %338 = vrot.lane.b32.xlu0 %v3802_v3, %s3247_s25  ;;  %336 = vrot.lane.b32.xlu1 %v3775_v14, %s3247_s25  ;;  %v264_v18 = vmul.f32 %v3655_v13, %v3650_v16  ;;  %v710_v10 = vstv %s2818_s1 }
 0x1ae   :  { %v270_v34 = vadd.f32 %v262_v41, %v249_v35  ;;  %v271_v24 = vadd.f32 %v263_v20, %v250_v31  ;;  %v285_v29 = vmul.f32 %v3748_v33, %v3709_v50  ;;  %v4721_v35 = vld [vmem:[#allocation8_spill] sm:$0xff] }
 0x1af   :  { %v3852_v17 = vadd.f32 %v1230_v53, %v1217_v46  ;;  %v3856_v25 = vadd.f32 %v1229_v7, %v1216_v49  ;;  %v272_v15 = vadd.f32 %v264_v18, %v251_v32 }
 0x1b0   :  { %v3875_v26 = vadd.f32 %v284_v57, %v271_v24  ;;  %v3877_v6 = vadd.f32 %v283_v1, %v270_v34 }
 0x1b1   :  { %310 = vrot.lane.b32.xlu0 %v3854_v23, %s3244_s16  ;;  %308 = vrot.lane.b32.xlu1 %v3849_v21, %s3244_s16  ;;  %v3889_v30 = vadd.f32 %v285_v29, %v272_v15 }
 0x1b5   :  { %342 = vrot.lane.b32.xlu0 %v3854_v23, %s3247_s25  ;;  %340 = vrot.lane.b32.xlu1 %v3849_v21, %s3247_s25 }
 0x1b9   :  { %314 = vrot.lane.b32.xlu0 %v3875_v26, %s3244_s16  ;;  %312 = vrot.lane.b32.xlu1 %v3877_v6, %s3244_s16 }
 0x1bd   :  { %346 = vrot.lane.b32.xlu0 %v3875_v26, %s3247_s25  ;;  %344 = vrot.lane.b32.xlu1 %v3877_v6, %s3247_s25 }
 0x1c1   :  { %348 = vrot.lane.b32.xlu0 %v3889_v30, %s3247_s25  ;;  %316 = vrot.lane.b32.xlu1 %v3889_v30, %s3244_s16 }
 0x1c5   :  { %1249 = vrot.lane.b32.xlu0 %v3781_v54, %s3244_s16  ;;  %1247 = vrot.lane.b32.xlu1 %v3783_v0, %s3244_s16 }
 0x1c9   :  { %1279 = vrot.lane.b32.xlu0 %v3783_v0, %s3247_s25  ;;  %1251 = vrot.lane.b32.xlu1 %v3806_v43, %s3244_s16 }
 0x1cd   :  { %1283 = vrot.lane.b32.xlu0 %v3806_v43, %s3247_s25  ;;  %1281 = vrot.lane.b32.xlu1 %v3781_v54, %s3247_s25 }
 0x1d1   :  { %1255 = vrot.lane.b32.xlu0 %v3828_v40, %s3244_s16  ;;  %1253 = vrot.lane.b32.xlu1 %v3808_v44, %s3244_s16 }
 0x1d5   :  { %1287 = vrot.lane.b32.xlu0 %v3828_v40, %s3247_s25  ;;  %1285 = vrot.lane.b32.xlu1 %v3808_v44, %s3247_s25 }
 0x1d9   :  { %1259 = vrot.lane.b32.xlu0 %v3856_v25, %s3244_s16  ;;  %1257 = vrot.lane.b32.xlu1 %v3830_v36, %s3244_s16 }
 0x1dd   :  { %1291 = vrot.lane.b32.xlu0 %v3856_v25, %s3247_s25  ;;  %1289 = vrot.lane.b32.xlu1 %v3830_v36, %s3247_s25 }
 0x1e1   :  { %1293 = vrot.lane.b32.xlu0 %v3852_v17, %s3247_s25  ;;  %1261 = vrot.lane.b32.xlu1 %v3852_v17, %s3244_s16 }
 0x1f7   :  { %v648_v16 = vpop.permute.xlu0 %647  ;;  %v646_v13 = vpop.permute.xlu1 %645 }
 0x1f8   :  { %v669_v50 = vadd.f32 %v646_v13, %v3561_v8  ;;  %v670_v2 = vadd.f32 %v648_v16, %v3559_v63 }
 0x1fb   :  { %v678_v33 = vpop.permute.xlu0 %677  ;;  %v650_v28 = vpop.permute.xlu1 %649 }
 0x1fc   :  { %v701_v56 = vadd.f32 %v678_v33, %v669_v50  ;;  %v671_v58 = vadd.f32 %v650_v28, %v3580_v27 }
 0x1fe   :  { %v711_v39 = vadd.f32 %v710_v10, %v701_v56 }
 0x1ff   :  { %v682_v62 = vpop.permute.xlu0 %681  ;;  %v680_v22 = vpop.permute.xlu1 %679 }
 0x200   :  { %v3930_v42 = vmax.f32 %v711_v39, 0.0  ;;  %v703_v12 = vadd.f32 %v682_v62, %v671_v58  ;;  %v702_v37 = vadd.f32 %v680_v22, %v670_v2  ;;  %v367_v39 = vstv %s366_s23 }
 0x202   :  { %v713_v47 = vadd.f32 %v710_v10, %v703_v12  ;;  %v712_v38 = vadd.f32 %v710_v10, %v702_v37  ;;  %727 = vrot.lane.b32.xlu1 %v3930_v42, %s3248_s22 }
 0x203   :  { %v654_v8 = vpop.permute.xlu0 %653  ;;  %v652_v48 = vpop.permute.xlu1 %651 }
 0x204   :  { %v3934_v61 = vmax.f32 %v713_v47, 0.0  ;;  %v3936_v63 = vmax.f32 %v712_v38, 0.0  ;;  %v673_v27 = vadd.f32 %v654_v8, %v3621_v59  ;;  %v672_v5 = vadd.f32 %v652_v48, %v3623_v60  ;;  %v4720_v59 = vld [vmem:[#allocation7_spill] sm:$0xff] }
 0x206   :  { %730 = vrot.lane.b32.xlu0 %v3936_v63, %s3248_s22  ;;  %733 = vrot.lane.b32.xlu1 %v3934_v61, %s3248_s22 }
 0x207   :  { %v686_v51 = vpop.permute.xlu0 %685  ;;  %v684_v52 = vpop.permute.xlu1 %683 }
 0x208   :  { %v705_v11 = vadd.f32 %v686_v51, %v673_v27  ;;  %v704_v53 = vadd.f32 %v684_v52, %v672_v5 }
 0x20a   :  { %v715_v55 = vadd.f32 %v710_v10, %v705_v11  ;;  %v714_v4 = vadd.f32 %v710_v10, %v704_v53 }
 0x20b   :  { %v658_v49 = vpop.permute.xlu0 %657  ;;  %v656_v46 = vpop.permute.xlu1 %655 }
 0x20c   :  { %v3944_v7 = vmax.f32 %v715_v55, 0.0  ;;  %v3946_v41 = vmax.f32 %v714_v4, 0.0  ;;  %v675_v60 = vadd.f32 %v658_v49, %v4720_v59  ;;  %v674_v20 = vadd.f32 %v656_v46, %v4721_v35 }
 0x20e   :  { %736 = vrot.lane.b32.xlu0 %v3946_v41, %s3248_s22  ;;  %739 = vrot.lane.b32.xlu1 %v3944_v7, %s3248_s22 }
 0x20f   :  { %v690_v31 = vpop.permute.xlu0 %689  ;;  %v688_v34 = vpop.permute.xlu1 %687 }
 0x210   :  { %v707_v24 = vadd.f32 %v690_v31, %v675_v60  ;;  %v706_v45 = vadd.f32 %v688_v34, %v674_v20 }
 0x212   :  { %v717_v57 = vadd.f32 %v710_v10, %v707_v24  ;;  %v716_v1 = vadd.f32 %v710_v10, %v706_v45 }
 0x213   :  { %v692_v32 = vpop.permute.xlu0 %691  ;;  %v660_v18 = vpop.permute.xlu1 %659 }
 0x214   :  { %v3954_v15 = vmax.f32 %v717_v57, 0.0  ;;  %v3956_v29 = vmax.f32 %v716_v1, 0.0  ;;  %v676_v16 = vadd.f32 %v660_v18, %v3757_v19 }
 0x216   :  { %v708_v13 = vadd.f32 %v692_v32, %v676_v16  ;;  %742 = vrot.lane.b32.xlu0 %v3956_v29, %s3248_s22  ;;  %745 = vrot.lane.b32.xlu1 %v3954_v15, %s3248_s22 }
 0x217   :  { %v305_v50 = vpop.permute.xlu0 %304  ;;  %v303_v33 = vpop.permute.xlu1 %302 }
 0x218   :  { %v718_v28 = vadd.f32 %v710_v10, %v708_v13  ;;  %v326_v2 = vadd.f32 %v303_v33, %v3777_v9  ;;  %v327_v19 = vadd.f32 %v305_v50, %v3775_v14 }
 0x21a   :  { %v3963_v56 = vmax.f32 %v718_v28, 0.0 }
 0x21b   :  { %v335_v58 = vpop.permute.xlu0 %334  ;;  %v307_v62 = vpop.permute.xlu1 %306 }
 0x21c   :  { %v358_v22 = vadd.f32 %v335_v58, %v326_v2  ;;  %748 = vrot.lane.b32.xlu0 %v3963_v56, %s3248_s22  ;;  %v328_v37 = vadd.f32 %v307_v62, %v3802_v3 }
 0x21e   :  { %v368_v12 = vadd.f32 %v367_v39, %v358_v22  ;;  %v1312_v22 = vstv %s2843_s24 }
 0x21f   :  { %v339_v47 = vpop.permute.xlu0 %338  ;;  %v337_v38 = vpop.permute.xlu1 %336 }
 0x220   :  { %v3970_v8 = vmax.f32 %v368_v12, 0.0  ;;  %v360_v10 = vadd.f32 %v339_v47, %v328_v37  ;;  %v359_v48 = vadd.f32 %v337_v38, %v327_v19 }
 0x222   :  { %v370_v27 = vadd.f32 %v367_v39, %v360_v10  ;;  %v369_v9 = vadd.f32 %v367_v39, %v359_v48  ;;  %385 = vrot.lane.b32.xlu1 %v3970_v8, %s3248_s22 }
 0x223   :  { %v311_v5 = vpop.permute.xlu0 %310  ;;  %v309_v51 = vpop.permute.xlu1 %308 }
 0x224   :  { %v3974_v52 = vmax.f32 %v370_v27, 0.0  ;;  %v3976_v11 = vmax.f32 %v369_v9, 0.0  ;;  %v330_v14 = vadd.f32 %v311_v5, %v3854_v23  ;;  %v329_v3 = vadd.f32 %v309_v51, %v3849_v21 }
 0x226   :  { %391 = vrot.lane.b32.xlu1 %v3974_v52, %s3248_s22  ;;  %388 = vrot.lane.b32.xlu0 %v3976_v11, %s3248_s22 }
 0x227   :  { %v343_v53 = vpop.permute.xlu0 %342  ;;  %v341_v55 = vpop.permute.xlu1 %340 }
 0x228   :  { %v362_v4 = vadd.f32 %v343_v53, %v330_v14  ;;  %v361_v49 = vadd.f32 %v341_v55, %v329_v3 }
 0x22a   :  { %v372_v46 = vadd.f32 %v367_v39, %v362_v4  ;;  %v371_v59 = vadd.f32 %v367_v39, %v361_v49 }
 0x22b   :  { %v315_v60 = vpop.permute.xlu0 %314  ;;  %v313_v35 = vpop.permute.xlu1 %312 }
 0x22c   :  { %v3984_v20 = vmax.f32 %v372_v46, 0.0  ;;  %v3986_v31 = vmax.f32 %v371_v59, 0.0  ;;  %v332_v21 = vadd.f32 %v315_v60, %v3875_v26  ;;  %v331_v23 = vadd.f32 %v313_v35, %v3877_v6 }
 0x22e   :  { %397 = vrot.lane.b32.xlu1 %v3984_v20, %s3248_s22  ;;  %394 = vrot.lane.b32.xlu0 %v3986_v31, %s3248_s22 }
 0x22f   :  { %v347_v34 = vpop.permute.xlu0 %346  ;;  %v345_v24 = vpop.permute.xlu1 %344 }
 0x230   :  { %v364_v45 = vadd.f32 %v347_v34, %v332_v21  ;;  %v363_v57 = vadd.f32 %v345_v24, %v331_v23 }
 0x232   :  { %v374_v1 = vadd.f32 %v367_v39, %v364_v45  ;;  %v373_v32 = vadd.f32 %v367_v39, %v363_v57 }
 0x233   :  { %v349_v18 = vpop.permute.xlu0 %348  ;;  %v317_v16 = vpop.permute.xlu1 %316 }
 0x234   :  { %v3994_v13 = vmax.f32 %v374_v1, 0.0  ;;  %v3996_v26 = vmax.f32 %v373_v32, 0.0  ;;  %v333_v6 = vadd.f32 %v317_v16, %v3889_v30 }
 0x236   :  { %v365_v50 = vadd.f32 %v349_v18, %v333_v6  ;;  %403 = vrot.lane.b32.xlu1 %v3994_v13, %s3248_s22  ;;  %400 = vrot.lane.b32.xlu0 %v3996_v26, %s3248_s22 }
 0x237   :  { %v1250_v33 = vpop.permute.xlu0 %1249  ;;  %v1248_v28 = vpop.permute.xlu1 %1247 }
 0x238   :  { %v375_v2 = vadd.f32 %v367_v39, %v365_v50  ;;  %v1271_v62 = vadd.f32 %v1248_v28, %v3783_v0  ;;  %v1272_v30 = vadd.f32 %v1250_v33, %v3781_v54 }
 0x23a   :  { %v4003_v58 = vmax.f32 %v375_v2, 0.0 }
 0x23b   :  { %v1280_v19 = vpop.permute.xlu0 %1279  ;;  %v1252_v12 = vpop.permute.xlu1 %1251 }
 0x23c   :  { %v1303_v37 = vadd.f32 %v1280_v19, %v1271_v62  ;;  %406 = vrot.lane.b32.xlu0 %v4003_v58, %s3248_s22  ;;  %v1273_v38 = vadd.f32 %v1252_v12, %v3806_v43 }
 0x23e   :  { %v1313_v47 = vadd.f32 %v1312_v22, %v1303_v37 }
 0x23f   :  { %v1284_v10 = vpop.permute.xlu0 %1283  ;;  %v1282_v48 = vpop.permute.xlu1 %1281 }
 0x240   :  { %v4010_v27 = vmax.f32 %v1313_v47, 0.0  ;;  %v1305_v39 = vadd.f32 %v1284_v10, %v1273_v38  ;;  %v1304_v9 = vadd.f32 %v1282_v48, %v1272_v30 }
 0x242   :  { %v1315_v5 = vadd.f32 %v1312_v22, %v1305_v39  ;;  %v1314_v0 = vadd.f32 %v1312_v22, %v1304_v9  ;;  %1329 = vrot.lane.b32.xlu1 %v4010_v27, %s3248_s22 }
 0x243   :  { %v1256_v51 = vpop.permute.xlu0 %1255  ;;  %v1254_v14 = vpop.permute.xlu1 %1253 }
 0x244   :  { %v4014_v3 = vmax.f32 %v1315_v5, 0.0  ;;  %v4016_v53 = vmax.f32 %v1314_v0, 0.0  ;;  %v1275_v54 = vadd.f32 %v1256_v51, %v3828_v40  ;;  %v1274_v43 = vadd.f32 %v1254_v14, %v3808_v44 }
 0x246   :  { %1335 = vrot.lane.b32.xlu1 %v4014_v3, %s3248_s22  ;;  %1332 = vrot.lane.b32.xlu0 %v4016_v53, %s3248_s22 }
 0x247   :  { %v1288_v55 = vpop.permute.xlu0 %1287  ;;  %v1286_v4 = vpop.permute.xlu1 %1285 }
 0x248   :  { %v1307_v49 = vadd.f32 %v1288_v55, %v1275_v54  ;;  %v1306_v46 = vadd.f32 %v1286_v4, %v1274_v43 }
 0x24a   :  { %v1317_v59 = vadd.f32 %v1312_v22, %v1307_v49  ;;  %v1316_v60 = vadd.f32 %v1312_v22, %v1306_v46 }
 0x24b   :  { %v1260_v35 = vpop.permute.xlu0 %1259  ;;  %v1258_v21 = vpop.permute.xlu1 %1257 }
 0x24c   :  { %v4024_v23 = vmax.f32 %v1317_v59, 0.0  ;;  %v4026_v34 = vmax.f32 %v1316_v60, 0.0  ;;  %v1277_v44 = vadd.f32 %v1260_v35, %v3856_v25  ;;  %v1276_v40 = vadd.f32 %v1258_v21, %v3830_v36 }
 0x24e   :  { %1341 = vrot.lane.b32.xlu1 %v4024_v23, %s3248_s22  ;;  %1338 = vrot.lane.b32.xlu0 %v4026_v34, %s3248_s22 }
 0x24f   :  { %v1292_v24 = vpop.permute.xlu0 %1291  ;;  %v1290_v45 = vpop.permute.xlu1 %1289 }
 0x250   :  { %v1309_v57 = vadd.f32 %v1292_v24, %v1277_v44  ;;  %v1308_v1 = vadd.f32 %v1290_v45, %v1276_v40 }
 0x252   :  { %v1319_v32 = vadd.f32 %v1312_v22, %v1309_v57  ;;  %v1318_v18 = vadd.f32 %v1312_v22, %v1308_v1 }
 0x253   :  { %v1262_v16 = vpop.permute.xlu1 %1261  ;;  %v1294_v36 = vpop.permute.xlu0 %1293 }
 0x254   :  { %v4034_v6 = vmax.f32 %v1319_v32, 0.0  ;;  %v4036_v50 = vmax.f32 %v1318_v18, 0.0  ;;  %v1278_v25 = vadd.f32 %v1262_v16, %v3852_v17 }
 0x256   :  { %v1310_v33 = vadd.f32 %v1294_v36, %v1278_v25  ;;  %1347 = vrot.lane.b32.xlu1 %v4034_v6, %s3248_s22  ;;  %1344 = vrot.lane.b32.xlu0 %v4036_v50, %s3248_s22 }
 0x258   :  { %v1320_v28 = vadd.f32 %v1312_v22, %v1310_v33 }
 0x25a   :  { %v4043_v2 = vmax.f32 %v1320_v28, 0.0 }
 0x25c   :  { %1350 = vrot.lane.b32.xlu0 %v4043_v2, %s3248_s22 }
 0x274   :  { %v728_v62 = vpop.permute.xlu1 %727 }
 0x275   :  { %v729_v19 = vsel %vm384_vm2, %v728_v62, %v3930_v42 }
 0x276   :  { %751 = vrot.lane.b32.xlu1 %v729_v19, %s3248_s22 }
 0x278   :  { %v731_v17 = vpop.permute.xlu0 %730  ;;  %v734_v12 = vpop.permute.xlu1 %733 }
 0x279   :  { %v732_v37 = vsel %vm384_vm2, %v731_v17, %v3936_v63  ;;  %v735_v22 = vsel %vm384_vm2, %v734_v12, %v3934_v61 }
 0x27a   :  { %753 = vrot.lane.b32.xlu0 %v732_v37, %s3248_s22  ;;  %755 = vrot.lane.b32.xlu1 %v735_v22, %s3248_s22 }
 0x280   :  { %v737_v30 = vpop.permute.xlu0 %736  ;;  %v740_v47 = vpop.permute.xlu1 %739 }
 0x281   :  { %v738_v38 = vsel %vm384_vm2, %v737_v30, %v3946_v41  ;;  %v741_v10 = vsel %vm384_vm2, %v740_v47, %v3944_v7 }
 0x282   :  { %757 = vrot.lane.b32.xlu0 %v738_v38, %s3248_s22  ;;  %759 = vrot.lane.b32.xlu1 %v741_v10, %s3248_s22  ;;  %v2819_v38 = vld [vmem:[%s4702_s3 + $0x20] sm:$0xff]  ;;  %v2820_v10 = vld [vmem:[%s4702_s3 + $0x28] sm:$0xff] }
 0x288   :  { %v743_v48 = vpop.permute.xlu0 %742  ;;  %v746_v39 = vpop.permute.xlu1 %745 }
 0x289   :  { %v744_v9 = vsel %vm384_vm2, %v743_v48, %v3956_v29  ;;  %v747_v5 = vsel %vm384_vm2, %v746_v39, %v3954_v15  ;;  %v3143_v48 = vpack.c.bf16 %v2820_v10, %v2819_v38  ;;  %v2821_v39 = vld [vmem:[%s4702_s3 + $0x30] sm:$0xff] }
 0x28a   :  { %761 = vrot.lane.b32.xlu0 %v744_v9, %s3248_s22  ;;  %763 = vrot.lane.b32.xlu1 %v747_v5, %s3248_s22  ;;  %v2822_v9 = vld [vmem:[%s4702_s3 + $0x38] sm:$0xff] }
 0x28b   :  { %3144 = vmatprep.subr.bf16.mxu0 %v3143_v48  ;;  %v3147_v5 = vpack.c.bf16 %v2822_v9, %v2821_v39 }
 0x28c   :  { %3146 = vmatpush3.bf16.msra.mxu0 %v3143_v48 }
 0x28d   :  { %3148 = vmatprep.subr.bf16.mxu0 %v3147_v5 }
 0x28e   :  { %v749_v0 = vpop.permute.xlu0 %748 }
 0x28f   :  { %v750_v51 = vsel %vm384_vm2, %v749_v0, %v3963_v56 }
 0x290   :  { %765 = vrot.lane.b32.xlu0 %v750_v51, %s3248_s22  ;;  %3150 = vmatpush3.bf16.msra.mxu0 %v3147_v5 }
 0x294   :  { %v386_v14 = vpop.permute.xlu1 %385 }
 0x295   :  { %v387_v54 = vsel %vm384_vm2, %v386_v14, %v3970_v8 }
 0x296   :  { %409 = vrot.lane.b32.xlu1 %v387_v54, %s3248_s22 }
 0x298   :  { %v389_v43 = vpop.permute.xlu0 %388  ;;  %v392_v55 = vpop.permute.xlu1 %391 }
 0x299   :  { %v390_v4 = vsel %vm384_vm2, %v389_v43, %v3976_v11  ;;  %v393_v49 = vsel %vm384_vm2, %v392_v55, %v3974_v52 }
 0x29a   :  { %411 = vrot.lane.b32.xlu0 %v390_v4, %s3248_s22  ;;  %413 = vrot.lane.b32.xlu1 %v393_v49, %s3248_s22 }
 0x2a0   :  { %v395_v46 = vpop.permute.xlu0 %394  ;;  %v398_v59 = vpop.permute.xlu1 %397 }
 0x2a1   :  { %v396_v60 = vsel %vm384_vm2, %v395_v46, %v3986_v31  ;;  %v399_v35 = vsel %vm384_vm2, %v398_v59, %v3984_v20 }
 0x2a2   :  { %415 = vrot.lane.b32.xlu0 %v396_v60, %s3248_s22  ;;  %417 = vrot.lane.b32.xlu1 %v399_v35, %s3248_s22 }
 0x2a8   :  { %v401_v21 = vpop.permute.xlu0 %400  ;;  %v404_v44 = vpop.permute.xlu1 %403 }
 0x2a9   :  { %v402_v40 = vsel %vm384_vm2, %v401_v21, %v3996_v26  ;;  %v405_v24 = vsel %vm384_vm2, %v404_v44, %v3994_v13 }
 0x2aa   :  { %419 = vrot.lane.b32.xlu0 %v402_v40, %s3248_s22  ;;  %421 = vrot.lane.b32.xlu1 %v405_v24, %s3248_s22  ;;  %v521_v40 = vld [vmem:[%s4702_s3] sm:$0xff]  ;;  %v522_v24 = vld [vmem:[%s4702_s3 + $0x8] sm:$0xff] }
 0x2ae   :  { %v407_v45 = vpop.permute.xlu0 %406 }
 0x2af   :  { %v408_v57 = vsel %vm384_vm2, %v407_v45, %v4003_v58  ;;  %v4158_v45 = vpack.c.bf16 %v522_v24, %v521_v40 }
 0x2b0   :  { %423 = vrot.lane.b32.xlu0 %v408_v57, %s3248_s22 }
 0x2b1   :  { %3152 = vmatprep.subr.bf16.mxu0 %v4158_v45 }
 0x2b4   :  { %v1330_v1 = vpop.permute.xlu1 %1329 }
 0x2b5   :  { %v1331_v32 = vsel %vm384_vm2, %v1330_v1, %v4010_v27 }
 0x2b6   :  { %1353 = vrot.lane.b32.xlu1 %v1331_v32, %s3248_s22 }
 0x2b8   :  { %v1333_v18 = vpop.permute.xlu0 %1332  ;;  %v1336_v16 = vpop.permute.xlu1 %1335 }
 0x2b9   :  { %v1334_v25 = vsel %vm384_vm2, %v1333_v18, %v4016_v53  ;;  %v1337_v36 = vsel %vm384_vm2, %v1336_v16, %v4014_v3 }
 0x2ba   :  { %1355 = vrot.lane.b32.xlu0 %v1334_v25, %s3248_s22  ;;  %1357 = vrot.lane.b32.xlu1 %v1337_v36, %s3248_s22 }
 0x2c0   :  { %v1339_v33 = vpop.permute.xlu0 %1338  ;;  %v1342_v28 = vpop.permute.xlu1 %1341 }
 0x2c1   :  { %v1340_v62 = vsel %vm384_vm2, %v1339_v33, %v4026_v34  ;;  %v1343_v19 = vsel %vm384_vm2, %v1342_v28, %v4024_v23 }
 0x2c2   :  { %1359 = vrot.lane.b32.xlu0 %v1340_v62, %s3248_s22  ;;  %1361 = vrot.lane.b32.xlu1 %v1343_v19, %s3248_s22 }
 0x2c8   :  { %v1345_v17 = vpop.permute.xlu0 %1344  ;;  %v1348_v12 = vpop.permute.xlu1 %1347 }
 0x2c9   :  { %v1346_v37 = vsel %vm384_vm2, %v1345_v17, %v4036_v50  ;;  %v1349_v22 = vsel %vm384_vm2, %v1348_v12, %v4034_v6 }
 0x2ca   :  { %1363 = vrot.lane.b32.xlu0 %v1346_v37, %s3248_s22  ;;  %1365 = vrot.lane.b32.xlu1 %v1349_v22, %s3248_s22 }
 0x2ce   :  { %v1351_v30 = vpop.permute.xlu0 %1350 }
 0x2cf   :  { %v1352_v47 = vsel %vm384_vm2, %v1351_v30, %v4043_v2 }
 0x2d0   :  { %1367 = vrot.lane.b32.xlu0 %v1352_v47, %s3248_s22  ;;  %s3249_s22 = smov 48  }
 0x2e8   :  { %v752_v0 = vpop.permute.xlu1 %751 }
 0x2e9   :  { %v767_v51 = vsel %vm384_vm2, %v752_v0, %v3930_v42 }
 0x2ea   :  { %799 = vrot.lane.b32.xlu1 %v767_v51, %s3246_s18 }
 0x2ec   :  { %v754_v14 = vpop.permute.xlu0 %753  ;;  %v756_v54 = vpop.permute.xlu1 %755 }
 0x2ed   :  { %v768_v43 = vsel %vm384_vm2, %v754_v14, %v3936_v63  ;;  %v769_v55 = vsel %vm384_vm2, %v756_v54, %v3934_v61 }
 0x2ee   :  { %801 = vrot.lane.b32.xlu0 %v768_v43, %s3246_s18  ;;  %803 = vrot.lane.b32.xlu1 %v769_v55, %s3246_s18 }
 0x2f4   :  { %v758_v4 = vpop.permute.xlu0 %757  ;;  %v760_v49 = vpop.permute.xlu1 %759 }
 0x2f5   :  { %v770_v46 = vsel %vm384_vm2, %v758_v4, %v3946_v41  ;;  %v771_v59 = vsel %vm384_vm2, %v760_v49, %v3944_v7 }
 0x2f6   :  { %805 = vrot.lane.b32.xlu0 %v770_v46, %s3246_s18  ;;  %807 = vrot.lane.b32.xlu1 %v771_v59, %s3246_s18 }
 0x2fc   :  { %v762_v60 = vpop.permute.xlu0 %761  ;;  %v764_v35 = vpop.permute.xlu1 %763 }
 0x2fd   :  { %v772_v21 = vsel %vm384_vm2, %v762_v60, %v3956_v29  ;;  %v773_v44 = vsel %vm384_vm2, %v764_v35, %v3954_v15 }
 0x2fe   :  { %809 = vrot.lane.b32.xlu0 %v772_v21, %s3246_s18  ;;  %811 = vrot.lane.b32.xlu1 %v773_v44, %s3246_s18  ;;  %v776_v21 = vrot.slane %v3936_v63, 1  ;;  %v777_v44 = vrot.slane %v3934_v61, 1 }
 0x302   :  { %v766_v57 = vpop.permute.xlu0 %765 }
 0x303   :  { %v774_v1 = vsel %vm384_vm2, %v766_v57, %v3963_v56 }
 0x304   :  { %813 = vrot.lane.b32.xlu0 %v774_v1, %s3246_s18 }
 0x308   :  { %v410_v32 = vpop.permute.xlu1 %409 }
 0x309   :  { %v425_v18 = vsel %vm384_vm2, %v410_v32, %v3970_v8 }
 0x30a   :  { %457 = vrot.lane.b32.xlu1 %v425_v18, %s3246_s18  ;;  %v775_v18 = vrot.slane %v3930_v42, 1 }
 0x30c   :  { %v412_v16 = vpop.permute.xlu0 %411  ;;  %v414_v25 = vpop.permute.xlu1 %413 }
 0x30d   :  { %v426_v36 = vsel %vm384_vm2, %v412_v16, %v3976_v11  ;;  %v427_v33 = vsel %vm384_vm2, %v414_v25, %v3974_v52  ;;  %v788_v25 = vsel %vm125_vm1, %v776_v21, %v777_v44  ;;  %v3254_v16 = vmov 0.0  }
 0x30e   :  { %459 = vrot.lane.b32.xlu0 %v426_v36, %s3246_s18  ;;  %461 = vrot.lane.b32.xlu1 %v427_v33, %s3246_s18  ;;  %v789_v33 = vsel %vm125_vm1, %v775_v18, %v776_v21 }
 0x314   :  { %v416_v28 = vpop.permute.xlu0 %415  ;;  %v418_v62 = vpop.permute.xlu1 %417 }
 0x315   :  { %v428_v19 = vsel %vm384_vm2, %v416_v28, %v3986_v31  ;;  %v429_v17 = vsel %vm384_vm2, %v418_v62, %v3984_v20 }
 0x316   :  { %463 = vrot.lane.b32.xlu0 %v428_v19, %s3246_s18  ;;  %465 = vrot.lane.b32.xlu1 %v429_v17, %s3246_s18 }
 0x31c   :  { %v420_v12 = vpop.permute.xlu0 %419  ;;  %v422_v37 = vpop.permute.xlu1 %421 }
 0x31d   :  { %v430_v22 = vsel %vm384_vm2, %v420_v12, %v3996_v26  ;;  %v431_v30 = vsel %vm384_vm2, %v422_v37, %v3994_v13  ;;  %v523_v37 = vld [vmem:[%s4702_s3 + $0x10] sm:$0xff] }
 0x31e   :  { %467 = vrot.lane.b32.xlu0 %v430_v22, %s3246_s18  ;;  %469 = vrot.lane.b32.xlu1 %v431_v30, %s3246_s18  ;;  %v524_v22 = vld [vmem:[%s4702_s3 + $0x18] sm:$0xff]  ;;  %v778_v30 = vrot.slane %v3946_v41, 1 }
 0x322   :  { %v424_v47 = vpop.permute.xlu0 %423 }
 0x323   :  { %v432_v38 = vsel %vm384_vm2, %v424_v47, %v4003_v58 }
 0x324   :  { %471 = vrot.lane.b32.xlu0 %v432_v38, %s3246_s18 }
 0x328   :  { %v1354_v10 = vpop.permute.xlu1 %1353 }
 0x329   :  { %v1369_v48 = vsel %vm384_vm2, %v1354_v10, %v4010_v27  ;;  %v779_v10 = vrot.slane %v3944_v7, 1 }
 0x32a   :  { %1401 = vrot.lane.b32.xlu1 %v1369_v48, %s3246_s18  ;;  %v3155_v48 = vpack.c.bf16 %v524_v22, %v523_v37 }
 0x32c   :  { %v1356_v39 = vpop.permute.xlu0 %1355  ;;  %v1358_v9 = vpop.permute.xlu1 %1357 }
 0x32d   :  { %v1370_v5 = vsel %vm384_vm2, %v1356_v39, %v4016_v53  ;;  %v1371_v0 = vsel %vm384_vm2, %v1358_v9, %v4014_v3  ;;  %v2844_v9 = vld [vmem:[%s4702_s3 + $0x40] sm:$0xff] }
 0x32e   :  { %1403 = vrot.lane.b32.xlu0 %v1370_v5, %s3246_s18  ;;  %1405 = vrot.lane.b32.xlu1 %v1371_v0, %s3246_s18  ;;  %v2845_v5 = vld [vmem:[%s4702_s3 + $0x48] sm:$0xff] }
 0x334   :  { %v1360_v51 = vpop.permute.xlu0 %1359  ;;  %v1362_v14 = vpop.permute.xlu1 %1361 }
 0x335   :  { %v1372_v54 = vsel %vm384_vm2, %v1360_v51, %v4026_v34  ;;  %v1373_v43 = vsel %vm384_vm2, %v1362_v14, %v4024_v23  ;;  %v787_v14 = vsel %vm125_vm1, %v777_v44, %v778_v30  ;;  %v780_v44 = vrot.slane %v3956_v29, 1 }
 0x336   :  { %1407 = vrot.lane.b32.xlu0 %v1372_v54, %s3246_s18  ;;  %1409 = vrot.lane.b32.xlu1 %v1373_v43, %s3246_s18  ;;  %v786_v43 = vsel %vm125_vm1, %v778_v30, %v779_v10 }
 0x33c   :  { %v1364_v55 = vpop.permute.xlu0 %1363  ;;  %v1366_v4 = vpop.permute.xlu1 %1365 }
 0x33d   :  { %v1374_v49 = vsel %vm384_vm2, %v1364_v55, %v4036_v50  ;;  %v1375_v46 = vsel %vm384_vm2, %v1366_v4, %v4034_v6  ;;  %v4258_v4 = vpack.c.bf16 %v2845_v5, %v2844_v9 }
 0x33e   :  { %1411 = vrot.lane.b32.xlu0 %v1374_v49, %s3246_s18  ;;  %1413 = vrot.lane.b32.xlu1 %v1375_v46, %s3246_s18 }
 0x342   :  { %v1368_v59 = vpop.permute.xlu0 %1367 }
 0x343   :  { %v1376_v60 = vsel %vm384_vm2, %v1368_v59, %v4043_v2 }
 0x344   :  { %1415 = vrot.lane.b32.xlu0 %v1376_v60, %s3246_s18 }
 0x35c   :  { %v4212_v35 = vpop.permute.xlu1 %799 }
 0x35d   :  { %v823_v57 = vrot.slane %v4212_v35, 1  ;;  %v839_v62 = vmax.f32 %v3930_v42, %v4212_v35  ;;  %v434_v35 = vrot.slane %v3976_v11, 1 }
 0x360   :  { %v802_v40 = vpop.permute.xlu0 %801  ;;  %v804_v24 = vpop.permute.xlu1 %803 }
 0x361   :  { %v824_v1 = vrot.slane %v802_v40, 1  ;;  %v825_v32 = vrot.slane %v804_v24, 1  ;;  %v840_v19 = vmax.f32 %v3936_v63, %v802_v40  ;;  %v841_v49 = vmax.f32 %v3934_v61, %v804_v24 }
 0x362   :  { %v781_v40 = vrot.slane %v3954_v15, 1  ;;  %v785_v61 = vsel %vm125_vm1, %v779_v10, %v780_v44 }
 0x363   :  { %v836_v36 = vsel %vm125_vm1, %v824_v1, %v825_v32  ;;  %v837_v28 = vsel %vm125_vm1, %v823_v57, %v824_v1 }
 0x364   :  { %v848_v17 = vmax.f32 %v788_v25, %v836_v36  ;;  %v847_v12 = vmax.f32 %v789_v33, %v837_v28  ;;  %v784_v24 = vsel %vm125_vm1, %v780_v44, %v781_v40  ;;  %v2846_v44 = vld [vmem:[%s4702_s3 + $0x50] sm:$0xff] }
 0x366   :  { %v855_v47 = vmax.f32 %v839_v62, %v847_v12  ;;  %v856_v38 = vmax.f32 %v840_v19, %v848_v17  ;;  %v782_v12 = vrot.slane %v3963_v56, 1 }
 0x368   :  { %v806_v39 = vpop.permute.xlu0 %805  ;;  %2984 = vmatprep.mubr.msk.f32.mxu0 %vm868_vm3, %v855_v47  ;;  %v808_v63 = vpop.permute.xlu1 %807 }
 0x369   :  { %v826_v0 = vrot.slane %v806_v39, 1  ;;  %v827_v51 = vrot.slane %v808_v63, 1  ;;  %2985 = vmatmul.mubr.msk.f32.vlgmr.msra.gmra.mrb[0].mxu0 %vm868_vm3, %v856_v38  ;;  %v842_v46 = vmax.f32 %v3946_v41, %v806_v39  ;;  %v843_v28 = vmax.f32 %v3944_v7, %v808_v63 }
 0x36a   :  { %3154 = vmatpush3.bf16.msra.mxu0 %v4158_v45  ;;  %v783_v38 = vsel %vm125_vm1, %v781_v40, %v782_v12  ;;  %v790_v7 = vsel %vm125_vm1, %v782_v12, %v775_v18  ;;  %v2847_v40 = vld [vmem:[%s4702_s3 + $0x58] sm:$0xff] }
 0x36b   :  { %v835_v54 = vsel %vm125_vm1, %v825_v32, %v826_v0  ;;  %v834_v55 = vsel %vm125_vm1, %v826_v0, %v827_v51  ;;  %3156 = vmatprep.subr.bf16.mxu0 %v3155_v48 }
 0x36c   :  { %v849_v59 = vmax.f32 %v787_v14, %v835_v54  ;;  %v850_v60 = vmax.f32 %v786_v43, %v834_v55 }
 0x36e   :  { %v857_v21 = vmax.f32 %v841_v49, %v849_v59  ;;  %v858_v45 = vmax.f32 %v842_v46, %v850_v60  ;;  %3158 = vmatpush3.bf16.msra.mxu0 %v3155_v48 }
 0x36f   :  { %3160 = vmatprep.subr.bf16.mxu0 %v4258_v4 }
 0x370   :  { %v810_v1 = vpop.permute.xlu0 %809  ;;  %2987 = vmatprep.mubr.msk.f32.mxu0 %vm868_vm3, %v857_v21  ;;  %v812_v32 = vpop.permute.xlu1 %811 }
 0x371   :  { %v828_v25 = vrot.slane %v810_v1, 1  ;;  %v829_v36 = vrot.slane %v812_v32, 1  ;;  %2988 = vmatmul.mubr.msk.f32.gmra.mrb[2].mxu0 %vm868_vm3, %v858_v45  ;;  %v844_v62 = vmax.f32 %v3956_v29, %v810_v1  ;;  %v845_v48 = vmax.f32 %v3954_v15, %v812_v32 }
 0x373   :  { %v833_v41 = vsel %vm125_vm1, %v827_v51, %v828_v25  ;;  %v832_v33 = vsel %vm125_vm1, %v828_v25, %v829_v36  ;;  %v436_v25 = vrot.slane %v3986_v31, 1 }
 0x374   :  { %v851_v19 = vmax.f32 %v785_v61, %v833_v41  ;;  %v852_v17 = vmax.f32 %v784_v24, %v832_v33  ;;  %v3163_v61 = vpack.c.bf16 %v2847_v40, %v2846_v44 }
 0x376   :  { %v814_v37 = vpop.permute.xlu0 %813  ;;  %v859_v22 = vmax.f32 %v843_v28, %v851_v19  ;;  %v860_v30 = vmax.f32 %v844_v62, %v852_v17 }
 0x377   :  { %v830_v47 = vrot.slane %v814_v37, 1  ;;  %v846_v39 = vmax.f32 %v3963_v56, %v814_v37  ;;  %v433_v56 = vrot.slane %v3970_v8, 1 }
 0x378   :  { %2990 = vmatprep.mubr.msk.f32.mxu0 %vm868_vm3, %v859_v22 }
 0x379   :  { %v831_v29 = vsel %vm125_vm1, %v829_v36, %v830_v47  ;;  %v838_v10 = vsel %vm125_vm1, %v830_v47, %v823_v57  ;;  %2991 = vmatmul.mubr.msk.f32.gmra.mrb[4].mxu0 %vm868_vm3, %v860_v30  ;;  %v435_v57 = vrot.slane %v3974_v52, 1  ;;  %v447_v43 = vsel %vm125_vm1, %v433_v56, %v434_v35 }
 0x37a   :  { %v853_v63 = vmax.f32 %v783_v38, %v831_v29  ;;  %v854_v9 = vmax.f32 %v790_v7, %v838_v10  ;;  %v437_v36 = vrot.slane %v3984_v20, 1  ;;  %v438_v47 = vrot.slane %v3996_v26, 1 }
 0x37b   :  { %v446_v49 = vsel %vm125_vm1, %v434_v35, %v435_v57  ;;  %v445_v33 = vsel %vm125_vm1, %v435_v57, %v436_v25  ;;  %v439_v38 = vrot.slane %v3994_v13, 1  ;;  %v440_v57 = vrot.slane %v4003_v58, 1 }
 0x37c   :  { %v862_v42 = vmax.f32 %v846_v39, %v854_v9  ;;  %v4294_v5 = vpop.permute.xlu1 %457  ;;  %v861_v18 = vmax.f32 %v845_v48, %v853_v63  ;;  %v444_v62 = vsel %vm125_vm1, %v436_v25, %v437_v36 }
 0x37d   :  { %v481_v15 = vrot.slane %v4294_v5, 1  ;;  %v497_v59 = vmax.f32 %v3970_v8, %v4294_v5  ;;  %v442_v39 = vsel %vm125_vm1, %v438_v47, %v439_v38  ;;  %v1378_v5 = vrot.slane %v4016_v53, 1 }
 0x37e   :  { %2993 = vmatprep.mubr.msk.f32.mxu0 %vm868_vm3, %v861_v18 }
 0x37f   :  { %2994 = vmatmul.mubr.msk.f32.gmra.mrb[6].mxu0 %vm868_vm3, %v862_v42 }
 0x380   :  { %v460_v0 = vpop.permute.xlu0 %459  ;;  %v462_v51 = vpop.permute.xlu1 %461 }
 0x381   :  { %v482_v14 = vrot.slane %v460_v0, 1  ;;  %v483_v54 = vrot.slane %v462_v51, 1  ;;  %v498_v60 = vmax.f32 %v3976_v11, %v460_v0  ;;  %v499_v17 = vmax.f32 %v3974_v52, %v462_v51 }
 0x382   :  { %v443_v52 = vsel %vm125_vm1, %v437_v36, %v438_v47 }
 0x383   :  { %v495_v55 = vsel %vm125_vm1, %v481_v15, %v482_v14  ;;  %v494_v46 = vsel %vm125_vm1, %v482_v14, %v483_v54 }
 0x384   :  { %v505_v21 = vmax.f32 %v447_v43, %v495_v55  ;;  %v506_v45 = vmax.f32 %v446_v49, %v494_v46  ;;  %v441_v43 = vsel %vm125_vm1, %v439_v38, %v440_v57  ;;  %v448_v55 = vsel %vm125_vm1, %v440_v57, %v433_v56 }
 0x386   :  { %v514_v1 = vmax.f32 %v498_v60, %v506_v45  ;;  %v513_v32 = vmax.f32 %v497_v59, %v505_v21 }
 0x388   :  { %v464_v8 = vpop.permute.xlu0 %463  ;;  %3004 = vmatprep.mubr.msk.f32.mxu0 %vm868_vm3, %v513_v32  ;;  %v466_v11 = vpop.permute.xlu1 %465 }
 0x389   :  { %v484_v41 = vrot.slane %v464_v8, 1  ;;  %v485_v24 = vrot.slane %v466_v11, 1  ;;  %3005 = vmatmul.mubr.msk.f32.vlgmr.msra.gmra.mrb[0].mxu0 %vm868_vm3, %v514_v1  ;;  %v500_v12 = vmax.f32 %v3986_v31, %v464_v8  ;;  %v501_v9 = vmax.f32 %v3984_v20, %v466_v11 }
 0x38a   :  { %3162 = vmatpush3.bf16.msra.mxu0 %v4258_v4 }
 0x38b   :  { %v493_v28 = vsel %vm125_vm1, %v483_v54, %v484_v41  ;;  %v492_v19 = vsel %vm125_vm1, %v484_v41, %v485_v24  ;;  %3164 = vmatprep.subr.bf16.mxu0 %v3163_v61 }
 0x38c   :  { %v507_v37 = vmax.f32 %v445_v33, %v493_v28  ;;  %v508_v22 = vmax.f32 %v444_v62, %v492_v19  ;;  %v1380_v19 = vrot.slane %v4026_v34, 1 }
 0x38e   :  { %v515_v4 = vmax.f32 %v499_v17, %v507_v37  ;;  %v516_v30 = vmax.f32 %v500_v12, %v508_v22  ;;  %3166 = vmatpush3.bf16.msra.mxu0 %v3163_v61  ;;  %v1381_v17 = vrot.slane %v4024_v23, 1 }
 0x38f   :  { %3102 = vmatprep.subr.mxu0 %v3254_v16 }
 0x390   :  { %v468_v7 = vpop.permute.xlu0 %467  ;;  %3007 = vmatprep.mubr.msk.f32.mxu0 %vm868_vm3, %v515_v4  ;;  %v470_v29 = vpop.permute.xlu1 %469 }
 0x391   :  { %v486_v10 = vrot.slane %v468_v7, 1  ;;  %v487_v48 = vrot.slane %v470_v29, 1  ;;  %3008 = vmatmul.mubr.msk.f32.gmra.mrb[2].mxu0 %vm868_vm3, %v516_v30  ;;  %v502_v42 = vmax.f32 %v3996_v26, %v468_v7  ;;  %v503_v49 = vmax.f32 %v3994_v13, %v470_v29 }
 0x392   :  { %v1388_v30 = vsel %vm125_vm1, %v1380_v19, %v1381_v17 }
 0x393   :  { %v491_v31 = vsel %vm125_vm1, %v485_v24, %v486_v10  ;;  %v490_v63 = vsel %vm125_vm1, %v486_v10, %v487_v48 }
 0x394   :  { %v509_v18 = vmax.f32 %v443_v52, %v491_v31  ;;  %v510_v35 = vmax.f32 %v442_v39, %v490_v63  ;;  %v1382_v31 = vrot.slane %v4036_v50, 1  ;;  %v1383_v39 = vrot.slane %v4034_v6, 1 }
 0x396   :  { %v472_v0 = vpop.permute.xlu0 %471  ;;  %v517_v51 = vmax.f32 %v501_v9, %v509_v18  ;;  %v518_v14 = vmax.f32 %v502_v42, %v510_v35  ;;  %v1386_v35 = vsel %vm125_vm1, %v1382_v31, %v1383_v39 }
 0x397   :  { %v488_v54 = vrot.slane %v472_v0, 1  ;;  %v504_v46 = vmax.f32 %v4003_v58, %v472_v0  ;;  %v1377_v58 = vrot.slane %v4010_v27, 1 }
 0x398   :  { %3010 = vmatprep.mubr.msk.f32.mxu0 %vm868_vm3, %v517_v51 }
 0x399   :  { %v489_v20 = vsel %vm125_vm1, %v487_v48, %v488_v54  ;;  %v496_v26 = vsel %vm125_vm1, %v488_v54, %v481_v15  ;;  %3011 = vmatmul.mubr.msk.f32.gmra.mrb[4].mxu0 %vm868_vm3, %v518_v14  ;;  %v1379_v15 = vrot.slane %v4014_v3, 1  ;;  %v1391_v25 = vsel %vm125_vm1, %v1377_v58, %v1378_v5 }
 0x39a   :  { %v511_v59 = vmax.f32 %v441_v43, %v489_v20  ;;  %v512_v60 = vmax.f32 %v448_v55, %v496_v26  ;;  %v1384_v43 = vrot.slane %v4043_v2, 1 }
 0x39b   :  { %v1390_v61 = vsel %vm125_vm1, %v1378_v5, %v1379_v15 }
 0x39c   :  { %v520_v21 = vmax.f32 %v504_v46, %v512_v60  ;;  %v4365_v45 = vpop.permute.xlu1 %1401  ;;  %v519_v56 = vmax.f32 %v503_v49, %v511_v59  ;;  %v1385_v46 = vsel %vm125_vm1, %v1383_v39, %v1384_v43  ;;  %v1392_v59 = vsel %vm125_vm1, %v1384_v43, %v1377_v58 }
 0x39d   :  { %v1425_v13 = vrot.slane %v4365_v45, 1  ;;  %v1441_v11 = vmax.f32 %v4010_v27, %v4365_v45  ;;  %v1389_v27 = vsel %vm125_vm1, %v1379_v15, %v1380_v19 }
 0x39e   :  { %3013 = vmatprep.mubr.msk.f32.mxu0 %vm868_vm3, %v519_v56 }
 0x39f   :  { %3014 = vmatmul.mubr.msk.f32.gmra.mrb[6].mxu0 %vm868_vm3, %v520_v21 }
 0x3a0   :  { %v1404_v44 = vpop.permute.xlu0 %1403  ;;  %v1406_v40 = vpop.permute.xlu1 %1405 }
 0x3a1   :  { %v1426_v1 = vrot.slane %v1404_v44, 1  ;;  %v1427_v32 = vrot.slane %v1406_v40, 1  ;;  %v1442_v41 = vmax.f32 %v4016_v53, %v1404_v44  ;;  %v1443_v38 = vmax.f32 %v4014_v3, %v1406_v40  ;;  %v1607_v44 = vld [vmem:[%s4703_s4] sm:$0xff] }
 0x3a2   :  { %v1387_v3 = vsel %vm125_vm1, %v1381_v17, %v1382_v31  ;;  %3052 = vmatprep.mubr.msk.f32.mxu1 %vm1611_vm4, %v1607_v44 }
 0x3a3   :  { %v1439_v36 = vsel %vm125_vm1, %v1425_v13, %v1426_v1  ;;  %v1438_v8 = vsel %vm125_vm1, %v1426_v1, %v1427_v32 }
 0x3a4   :  { %v1449_v24 = vmax.f32 %v1391_v25, %v1439_v36  ;;  %v1450_v33 = vmax.f32 %v1390_v61, %v1438_v8 }
 0x3a6   :  { %v1458_v28 = vmax.f32 %v1442_v41, %v1450_v33  ;;  %v1457_v62 = vmax.f32 %v1441_v11, %v1449_v24  ;;  %v1608_v41 = vld [vmem:[%s4703_s4 + $0x8] sm:$0xff]  ;;  %v1609_v24 = vld [vmem:[%s4703_s4 + $0x10] sm:$0xff]  ;;  %v1610_v33 = vld [vmem:[%s4703_s4 + $0x18] sm:$0xff] }
 0x3a8   :  { %v1408_v12 = vpop.permute.xlu0 %1407  ;;  %3024 = vmatprep.mubr.msk.f32.mxu0 %vm868_vm3, %v1457_v62  ;;  %v1410_v37 = vpop.permute.xlu1 %1409 }
 0x3a9   :  { %v1428_v22 = vrot.slane %v1408_v12, 1  ;;  %v1429_v4 = vrot.slane %v1410_v37, 1  ;;  %3025 = vmatmul.mubr.msk.f32.vlgmr.msra.gmra.mrb[0].mxu0 %vm868_vm3, %v1458_v28  ;;  %v1444_v7 = vmax.f32 %v4026_v34, %v1408_v12  ;;  %v1445_v0 = vmax.f32 %v4024_v23, %v1410_v37 }
 0x3ab   :  { %v1437_v53 = vsel %vm125_vm1, %v1427_v32, %v1428_v22  ;;  %v1436_v47 = vsel %vm125_vm1, %v1428_v22, %v1429_v4 }
 0x3ac   :  { %v1451_v29 = vmax.f32 %v1389_v27, %v1437_v53  ;;  %v1452_v10 = vmax.f32 %v1388_v30, %v1436_v47 }
 0x3ae   :  { %v1459_v48 = vmax.f32 %v1443_v38, %v1451_v29  ;;  %v1460_v52 = vmax.f32 %v1444_v7, %v1452_v10 }
 0x3b0   :  { %v1412_v63 = vpop.permute.xlu0 %1411  ;;  %3027 = vmatprep.mubr.msk.f32.mxu0 %vm868_vm3, %v1459_v48  ;;  %v1414_v9 = vpop.permute.xlu1 %1413  ;;  %v2861_v48 = vld [vmem:[%s4704_s5 + $0x1] ss:$0 sm:$0xff] }
 0x3b1   :  { %v1430_v42 = vrot.slane %v1412_v63, 1  ;;  %v1431_v18 = vrot.slane %v1414_v9, 1  ;;  %3028 = vmatmul.mubr.msk.f32.gmra.mrb[2].mxu0 %vm868_vm3, %v1460_v52  ;;  %v1446_v51 = vmax.f32 %v4036_v50, %v1412_v63  ;;  %v1447_v60 = vmax.f32 %v4034_v6, %v1414_v9 }
 0x3b3   :  { %v1435_v34 = vsel %vm125_vm1, %v1429_v4, %v1430_v42  ;;  %v1434_v57 = vsel %vm125_vm1, %v1430_v42, %v1431_v18 }
 0x3b4   :  { %v1453_v14 = vmax.f32 %v1387_v3, %v1435_v34  ;;  %v1454_v54 = vmax.f32 %v1386_v35, %v1434_v57 }
 0x3b6   :  { %v1416_v55 = vpop.permute.xlu0 %1415  ;;  %v1461_v20 = vmax.f32 %v1445_v0, %v1453_v14  ;;  %v1462_v26 = vmax.f32 %v1446_v51, %v1454_v54 }
 0x3b7   :  { %v1432_v49 = vrot.slane %v1416_v55, 1  ;;  %v1448_v21 = vmax.f32 %v4043_v2, %v1416_v55 }
 0x3b8   :  { %3030 = vmatprep.mubr.msk.f32.mxu0 %vm868_vm3, %v1461_v20 }
 0x3b9   :  { %v1433_v23 = vsel %vm125_vm1, %v1431_v18, %v1432_v49  ;;  %v1440_v50 = vsel %vm125_vm1, %v1432_v49, %v1425_v13  ;;  %3031 = vmatmul.mubr.msk.f32.gmra.mrb[4].mxu0 %vm868_vm3, %v1462_v26 }
 0x3ba   :  { %v1455_v45 = vmax.f32 %v1385_v46, %v1433_v23  ;;  %v1456_v56 = vmax.f32 %v1392_v59, %v1440_v50  ;;  %v2860_v46 = vld [vmem:[%s4704_s5] ss:$0 sm:$0xff]  ;;  %v2862_v23 = vld [vmem:[%s4704_s5 + $0x2] ss:$0 sm:$0xff] }
 0x3bc   :  { %v1464_v5 = vmax.f32 %v1448_v21, %v1456_v56  ;;  %v1463_v15 = vmax.f32 %v1447_v60, %v1455_v45  ;;  %v2863_v21 = vld [vmem:[%s4704_s5 + $0x3] ss:$0 sm:$0xff]  ;;  %s3250_s5 = smov 112  }
 0x3be   :  { %3033 = vmatprep.mubr.msk.f32.mxu0 %vm868_vm3, %v1463_v15 }
 0x3bf   :  { %3034 = vmatmul.mubr.msk.f32.gmra.mrb[6].mxu0 %vm868_vm3, %v1464_v5 }
 0x3c0   :  { %3104 = vmatprep.mubr.msk.f32.mxu0 %vm3253_vm8, %v3254_v16 }
 0x47c   :  { %v3026_v40 = vpop.f32.mrb[0].mxu0 }
 0x47d   :  { %v1560_v13 = vpop.f32.mrb[1].mxu0 }
 0x47e   :  { %v3167_v6 = vpack.c.bf16 %v3026_v40, %v1560_v13 }
 0x480   :  { %3168 = vmatprep.subr.bf16.mxu1 %v3167_v6 }
 0x481   :  { %3170 = vmatpush3.bf16.msra.mxu1 %v3167_v6 }
 0x484   :  { %v3029_v2 = vpop.f32.mrb[2].mxu0 }
 0x485   :  { %v1570_v58 = vpop.f32.mrb[3].mxu0 }
 0x486   :  { %v3171_v1 = vpack.c.bf16 %v3029_v2, %v1570_v58 }
 0x488   :  { %3172 = vmatprep.subr.bf16.mxu1 %v3171_v1 }
 0x489   :  { %3174 = vmatpush3.bf16.msra.mxu1 %v3171_v1 }
 0x48c   :  { %v3032_v32 = vpop.f32.mrb[4].mxu0 }
 0x48d   :  { %v1580_v25 = vpop.f32.mrb[5].mxu0 }
 0x48e   :  { %v3175_v36 = vpack.c.bf16 %v3032_v32, %v1580_v25 }
 0x490   :  { %3176 = vmatprep.subr.bf16.mxu1 %v3175_v36 }
 0x491   :  { %3178 = vmatpush3.bf16.msra.mxu1 %v3175_v36 }
 0x492   :  { %v3035_v61 = vpop.f32.mrb[6].mxu0 }
 0x493   :  { %v1590_v8 = vpop.f32.mrb[7].mxu0 }
 0x494   :  { %v3179_v11 = vpack.c.bf16 %v3035_v61, %v1590_v8 }
 0x496   :  { %3180 = vmatprep.subr.bf16.mxu1 %v3179_v11 }
 0x497   :  { %3182 = vmatpush3.bf16.msra.mxu1 %v3179_v11 }
 0x49a   :  { %3053 = vmatmul.mubr.msk.f32.vlgmr.msra.gmra.mrb[0].mxu1 %vm1611_vm4, %v1608_v41 }
 0x49b   :  { %3055 = vmatprep.mubr.msk.f32.mxu1 %vm1611_vm4, %v1609_v24 }
 0x49e   :  { %3056 = vmatmul.mubr.msk.f32.gmra.mrb[2].mxu1 %vm1611_vm4, %v1610_v33 }
 0x56d   :  { %v3054_v28 = vpop.f32.mrb[0].mxu1 }
 0x56e   :  { %v1735_v62 = vrot.slane %v3054_v28, 1  ;;  %1713 = vrot.lane.b32.xlu0 %v3054_v28, %s3249_s22  ;;  %v1690_v19 = vpop.f32.mrb[1].mxu1  ;;  %v1772_v60 = vmul.f32 %v3054_v28, %v2860_v46 }
 0x56f   :  { %v1734_v17 = vrot.slane %v1690_v19, 1  ;;  %1710 = vrot.lane.b32.xlu1 %v1690_v19, %s3249_s22  ;;  %v1771_v50 = vmul.f32 %v2860_v46, %v1690_v19 }
 0x571   :  { %v4443_v12 = vpop.f32.mrb[2].mxu1  ;;  %v1740_v37 = vsel %vm125_vm1, %v1734_v17, %v1735_v62 }
 0x572   :  { %v1737_v22 = vrot.slane %v4443_v12, 1  ;;  %1719 = vrot.lane.b32.xlu0 %v4443_v12, %s3249_s22  ;;  %v4449_v4 = vpop.f32.mrb[3].mxu1  ;;  %v1813_v15 = vmul.f32 %v2862_v23, %v1740_v37  ;;  %v1774_v41 = vmul.f32 %v4443_v12, %v2860_v46 }
 0x573   :  { %v1736_v27 = vrot.slane %v4449_v4, 1  ;;  %1716 = vrot.lane.b32.xlu1 %v4449_v4, %s3249_s22  ;;  %v1773_v11 = vmul.f32 %v2860_v46, %v4449_v4 }
 0x574   :  { %v4455_v53 = vsel %vm125_vm1, %v1737_v22, %v1734_v17 }
 0x575   :  { %v1739_v30 = vsel %vm125_vm1, %v1735_v62, %v1736_v27  ;;  %v4461_v47 = vsel %vm125_vm1, %v1736_v27, %v1737_v22  ;;  %v1816_v37 = vmul.f32 %v2862_v23, %v4455_v53 }
 0x576   :  { %v1814_v13 = vmul.f32 %v2862_v23, %v1739_v30  ;;  %v1815_v17 = vmul.f32 %v2862_v23, %v4461_v47 }
 0x5e0   :  { %v1714_v38 = vpop.permute.xlu0 %1713 }
 0x5e1   :  { %v1715_v7 = vsel %vm1709_vm5, %v1714_v38, %v3054_v28  ;;  %v1711_v29 = vpop.permute.xlu1 %1710 }
 0x5e2   :  { %v1712_v10 = vsel %vm1709_vm5, %v1711_v29, %v1690_v19  ;;  %1724 = vrot.lane.b32.xlu0 %v1715_v7, %s3249_s22 }
 0x5e3   :  { %1722 = vrot.lane.b32.xlu1 %v1712_v10, %s3249_s22 }
 0x5e4   :  { %v1720_v39 = vpop.permute.xlu0 %1719 }
 0x5e5   :  { %v1717_v52 = vpop.permute.xlu1 %1716  ;;  %v1721_v63 = vsel %vm1709_vm5, %v1720_v39, %v4443_v12 }
 0x5e6   :  { %v1718_v31 = vsel %vm1709_vm5, %v1717_v52, %v4449_v4  ;;  %1781 = vrot.lane.b32.xlu0 %v2861_v48, %s3245_s14  ;;  %v1871_v52 = vstv %s4705_s6 }
 0x5e7   :  { %1726 = vrot.lane.b32.xlu1 %v1718_v31, %s3249_s22 }
 0x5eb   :  { %1728 = vrot.lane.b32.xlu1 %v1721_v63, %s3249_s22 }
 0x654   :  { %v1725_v9 = vpop.permute.xlu0 %1724 }
 0x655   :  { %v1731_v42 = vsel %vm1709_vm5, %v1725_v9, %v3054_v28  ;;  %v1723_v18 = vpop.permute.xlu1 %1722 }
 0x656   :  { %v1730_v3 = vsel %vm1709_vm5, %v1723_v18, %v1690_v19  ;;  %1748 = vrot.lane.b32.xlu1 %v1731_v42, %s3246_s18 }
 0x657   :  { %1746 = vrot.lane.b32.xlu0 %v1730_v3, %s3246_s18 }
 0x658   :  { %v1782_v34 = vpop.permute.xlu0 %1781 }
 0x659   :  { %v1784_v35 = vmul.f32 %v1782_v34, %v1730_v3  ;;  %v1785_v57 = vmul.f32 %v1782_v34, %v1731_v42  ;;  %v1727_v0 = vpop.permute.xlu1 %1726 }
 0x65a   :  { %v1732_v14 = vsel %vm1709_vm5, %v1727_v0, %v4449_v4 }
 0x65b   :  { %1794 = vrot.lane.b32.xlu1 %v1785_v57, %s3246_s18  ;;  %1792 = vrot.lane.b32.xlu0 %v1784_v35, %s3246_s18  ;;  %v1786_v43 = vmul.f32 %v1782_v34, %v1732_v14 }
 0x65d   :  { %v1729_v51 = vpop.permute.xlu1 %1728 }
 0x65e   :  { %v1733_v54 = vsel %vm1709_vm5, %v1729_v51, %v4443_v12 }
 0x65f   :  { %1750 = vrot.lane.b32.xlu0 %v1732_v14, %s3246_s18  ;;  %1752 = vrot.lane.b32.xlu1 %v1733_v54, %s3246_s18  ;;  %v1787_v55 = vmul.f32 %v1782_v34, %v1733_v54 }
 0x663   :  { %1796 = vrot.lane.b32.xlu0 %v1786_v43, %s3246_s18  ;;  %1798 = vrot.lane.b32.xlu1 %v1787_v55, %s3246_s18 }
 0x6c8   :  { %v1749_v20 = vpop.permute.xlu1 %1748 }
 0x6c9   :  { %v1759_v26 = vrot.slane %v1749_v20, 1  ;;  %v1747_v49 = vpop.permute.xlu0 %1746 }
 0x6ca   :  { %v1758_v59 = vrot.slane %v1747_v49, 1 }
 0x6cc   :  { %v1764_v45 = vsel %vm125_vm1, %v1758_v59, %v1759_v26 }
 0x6cd   :  { %v1793_v56 = vpop.permute.xlu0 %1792  ;;  %v1795_v5 = vpop.permute.xlu1 %1794  ;;  %v1826_v6 = vmul.f32 %v2863_v21, %v1764_v45 }
 0x6ce   :  { %v1804_v44 = vadd.f32 %v1793_v56, %v1771_v50  ;;  %v1805_v40 = vadd.f32 %v1795_v5, %v1772_v60 }
 0x6d0   :  { %v1817_v2 = vadd.f32 %v1813_v15, %v1804_v44  ;;  %v1818_v58 = vadd.f32 %v1814_v13, %v1805_v40  ;;  %v1949_v40 = vld [vmem:[%s4706_s7] sm:$0xff]  ;;  %v1950_v13 = vld [vmem:[%s4706_s7 + $0x8] sm:$0xff] }
 0x6d1   :  { %v1751_v1 = vpop.permute.xlu0 %1750  ;;  %v1753_v32 = vpop.permute.xlu1 %1752 }
 0x6d2   :  { %v1830_v25 = vadd.f32 %v1826_v6, %v1817_v2  ;;  %v1760_v36 = vrot.slane %v1751_v1, 1  ;;  %v1761_v61 = vrot.slane %v1753_v32, 1  ;;  %v3183_v2 = vpack.c.bf16 %v1950_v13, %v1949_v40  ;;  %v2882_v13 = vld [vmem:[%s4708_s9 + $0x20] sm:$0xff] }
 0x6d4   :  { %v1763_v8 = vsel %vm125_vm1, %v1759_v26, %v1760_v36  ;;  %1854 = vrot.lane.b32.xlu1 %v1830_v25, %s3244_s16  ;;  %1838 = vrot.lane.b32.xlu0 %v1830_v25, %s3250_s5  ;;  %v1762_v33 = vsel %vm125_vm1, %v1760_v36, %v1761_v61  ;;  %v1765_v12 = vsel %vm125_vm1, %v1761_v61, %v1758_v59 }
 0x6d5   :  { %v1827_v24 = vmul.f32 %v2863_v21, %v1763_v8  ;;  %v1797_v28 = vpop.permute.xlu0 %1796  ;;  %v1799_v62 = vpop.permute.xlu1 %1798  ;;  %v1828_v30 = vmul.f32 %v2863_v21, %v1762_v33  ;;  %v1829_v29 = vmul.f32 %v2863_v21, %v1765_v12  ;;  %3184 = vmatprep.subr.bf16.mxu1 %v3183_v2 }
 0x6d6   :  { %v1806_v19 = vadd.f32 %v1797_v28, %v1773_v11  ;;  %v1807_v22 = vadd.f32 %v1799_v62, %v1774_v41  ;;  %3186 = vmatpush3.bf16.msra.mxu1 %v3183_v2 }
 0x6d7   :  { %v1831_v27 = vadd.f32 %v1827_v24, %v1818_v58 }
 0x6d8   :  { %v1819_v38 = vadd.f32 %v1815_v17, %v1806_v19  ;;  %v1820_v7 = vadd.f32 %v1816_v37, %v1807_v22 }
 0x6d9   :  { %1856 = vrot.lane.b32.xlu0 %v1831_v27, %s3244_s16  ;;  %1840 = vrot.lane.b32.xlu1 %v1831_v27, %s3250_s5 }
 0x6da   :  { %v1832_v4 = vadd.f32 %v1828_v30, %v1819_v38  ;;  %v1833_v10 = vadd.f32 %v1829_v29, %v1820_v7 }
 0x6dd   :  { %1858 = vrot.lane.b32.xlu1 %v1832_v4, %s3244_s16  ;;  %1842 = vrot.lane.b32.xlu0 %v1832_v4, %s3250_s5 }
 0x6e1   :  { %1860 = vrot.lane.b32.xlu1 %v1833_v10, %s3244_s16  ;;  %1844 = vrot.lane.b32.xlu0 %v1833_v10, %s3250_s5 }
 0x746   :  { %v1839_v53 = vpop.permute.xlu0 %1838  ;;  %v1855_v47 = vpop.permute.xlu1 %1854 }
 0x747   :  { %v1850_v48 = vadd.f32 %v1839_v53, %v1830_v25 }
 0x749   :  { %v1866_v31 = vadd.f32 %v1855_v47, %v1850_v48 }
 0x74b   :  { %v1872_v39 = vadd.f32 %v1871_v52, %v1866_v31  ;;  %v1857_v63 = vpop.permute.xlu0 %1856  ;;  %v1841_v9 = vpop.permute.xlu1 %1840 }
 0x74c   :  { %v1851_v42 = vadd.f32 %v1841_v9, %v1831_v27 }
 0x74d   :  { %v4515_v18 = vmax.f32 %v1872_v39, 0.0 }
 0x74e   :  { %v1867_v3 = vadd.f32 %v1857_v63, %v1851_v42 }
 0x74f   :  { %v1859_v34 = vpop.permute.xlu1 %1858  ;;  %1881 = vrot.lane.b32.xlu0 %v4515_v18, %s3251_s0  ;;  %v1843_v35 = vpop.permute.xlu0 %1842  ;;  %v1905_v33 = vrot.slane %v4515_v18, 1 }
 0x750   :  { %v1873_v57 = vadd.f32 %v1871_v52, %v1867_v3  ;;  %v1852_v0 = vadd.f32 %v1843_v35, %v1832_v4 }
 0x752   :  { %v4518_v51 = vmax.f32 %v1873_v57, 0.0  ;;  %v1868_v14 = vadd.f32 %v1859_v34, %v1852_v0  ;;  %v3252_v57 = vmov 0.0|0.0  }
 0x753   :  { %v1845_v54 = vpop.permute.xlu0 %1844  ;;  %v1861_v20 = vpop.permute.xlu1 %1860  ;;  %3187 = vmatprep.subr.bf16.mxu1 %v3252_v57 }
 0x754   :  { %v1874_v43 = vadd.f32 %v1871_v52, %v1868_v14  ;;  %v1853_v55 = vadd.f32 %v1845_v54, %v1833_v10  ;;  %1884 = vrot.lane.b32.xlu1 %v4518_v51, %s3251_s0  ;;  %v1906_v11 = vrot.slane %v4518_v51, 1 }
 0x756   :  { %v4521_v26 = vmax.f32 %v1874_v43, 0.0  ;;  %v1869_v49 = vadd.f32 %v1861_v20, %v1853_v55  ;;  %v1911_v62 = vsel %vm125_vm1, %v1905_v33, %v1906_v11  ;;  %v2049_v20 = vld [vmem:[%s4707_s8] sm:$0xff] }
 0x758   :  { %v1875_v46 = vadd.f32 %v1871_v52, %v1869_v49  ;;  %1887 = vrot.lane.b32.xlu0 %v4521_v26, %s3251_s0  ;;  %v1907_v17 = vrot.slane %v4521_v26, 1  ;;  %v2050_v49 = vld [vmem:[%s4707_s8 + $0x8] sm:$0xff] }
 0x75a   :  { %v4524_v59 = vmax.f32 %v1875_v46, 0.0  ;;  %v1910_v7 = vsel %vm125_vm1, %v1906_v11, %v1907_v17  ;;  %v2051_v46 = vld [vmem:[%s4707_s8 + $0x10] sm:$0xff] }
 0x75c   :  { %1890 = vrot.lane.b32.xlu1 %v4524_v59, %s3251_s0  ;;  %v1908_v4 = vrot.slane %v4524_v59, 1 }
 0x75e   :  { %v1909_v52 = vsel %vm125_vm1, %v1907_v17, %v1908_v4  ;;  %v1912_v31 = vsel %vm125_vm1, %v1908_v4, %v1905_v33  ;;  %v2715_v33 = vld [vmem:[%s4710_s11] sm:$0xff]  ;;  %v2718_v17 = vld [vmem:[%s4710_s11 + $0x18] sm:$0x1] }
 0x7c1   :  { %v1882_v23 = vpop.permute.xlu0 %1881 }
 0x7c2   :  { %v1883_v50 = vsel %vm1880_vm6, %v1882_v23, %v4515_v18  ;;  %v2053_v23 = vld [vmem:[%s4707_s8 + $0x20] sm:$0xff] }
 0x7c3   :  { %1893 = vrot.lane.b32.xlu0 %v1883_v50, %s3251_s0  ;;  %v2054_v50 = vld [vmem:[%s4707_s8 + $0x28] sm:$0xff] }
 0x7c6   :  { %v1885_v60 = vpop.permute.xlu1 %1884 }
 0x7c7   :  { %v1886_v21 = vsel %vm1880_vm6, %v1885_v60, %v4518_v51  ;;  %v2055_v60 = vld [vmem:[%s4707_s8 + $0x30] sm:$0xff] }
 0x7c8   :  { %1895 = vrot.lane.b32.xlu1 %v1886_v21, %s3251_s0  ;;  %v2177_v21 = vld [vmem:[%s4708_s9] sm:$0xff] }
 0x7c9   :  { %3103 = vmatpush3.msra.mxu0 %v2177_v21 }
 0x7ca   :  { %v1888_v45 = vpop.permute.xlu0 %1887  ;;  %3112 = vmatprep.subr.mxu0 %v3254_v16 }
 0x7cb   :  { %v1889_v56 = vsel %vm1880_vm6, %v1888_v45, %v4521_v26  ;;  %v2880_v45 = vld [vmem:[%s4708_s9 + $0x18] sm:$0xff] }
 0x7cc   :  { %1897 = vrot.lane.b32.xlu0 %v1889_v56, %s3251_s0 }
 0x7ce   :  { %v1891_v5 = vpop.permute.xlu1 %1890 }
 0x7cf   :  { %v1892_v15 = vsel %vm1880_vm6, %v1891_v5, %v4524_v59 }
 0x7d0   :  { %1899 = vrot.lane.b32.xlu1 %v1892_v15, %s3251_s0  ;;  %v2878_v15 = vld [vmem:[%s4708_s9 + $0x10] sm:$0xff] }
 0x835   :  { %v1894_v44 = vpop.permute.xlu0 %1893 }
 0x836   :  { %v1901_v6 = vsel %vm1880_vm6, %v1894_v44, %v4515_v18 }
 0x837   :  { %1917 = vrot.lane.b32.xlu0 %v1901_v6, %s3246_s18 }
 0x83a   :  { %v1896_v58 = vpop.permute.xlu1 %1895 }
 0x83b   :  { %v1902_v1 = vsel %vm1880_vm6, %v1896_v58, %v4518_v51  ;;  %v2884_v58 = vld [vmem:[%s4708_s9 + $0x28] sm:$0xff] }
 0x83c   :  { %1919 = vrot.lane.b32.xlu1 %v1902_v1, %s3246_s18 }
 0x83e   :  { %v1898_v32 = vpop.permute.xlu0 %1897 }
 0x83f   :  { %v1903_v25 = vsel %vm1880_vm6, %v1898_v32, %v4521_v26 }
 0x840   :  { %1921 = vrot.lane.b32.xlu0 %v1903_v25, %s3246_s18  ;;  %v2886_v25 = vld [vmem:[%s4708_s9 + $0x30] sm:$0xff] }
 0x842   :  { %v1900_v36 = vpop.permute.xlu1 %1899 }
 0x843   :  { %v1904_v61 = vsel %vm1880_vm6, %v1900_v36, %v4524_v59 }
 0x844   :  { %1923 = vrot.lane.b32.xlu1 %v1904_v61, %s3246_s18 }
 0x8a9   :  { %v1918_v8 = vpop.permute.xlu0 %1917 }
 0x8aa   :  { %v1929_v24 = vrot.slane %v1918_v8, 1  ;;  %v1937_v37 = vmax.f32 %v4515_v18, %v1918_v8 }
 0x8ae   :  { %v1920_v41 = vpop.permute.xlu1 %1919 }
 0x8af   :  { %v1930_v28 = vrot.slane %v1920_v41, 1  ;;  %v1938_v29 = vmax.f32 %v4518_v51, %v1920_v41 }
 0x8b1   :  { %v1935_v19 = vsel %vm125_vm1, %v1929_v24, %v1930_v28 }
 0x8b2   :  { %v1941_v22 = vmax.f32 %v1911_v62, %v1935_v19  ;;  %v1922_v27 = vpop.permute.xlu0 %1921  ;;  %v2717_v19 = vld [vmem:[%s4710_s11 + $0x10] sm:$0xff] }
 0x8b3   :  { %v1931_v30 = vrot.slane %v1922_v27, 1  ;;  %v1939_v9 = vmax.f32 %v4521_v26, %v1922_v27  ;;  %v2875_v26 = vld [vmem:[%s4708_s9 + $0x8] sm:$0xff] }
 0x8b4   :  { %v1945_v38 = vmax.f32 %v1937_v37, %v1941_v22  ;;  %v3197_v37 = vpack.c.bf16 %v2718_v17, %v2717_v19 }
 0x8b5   :  { %v1934_v12 = vsel %vm125_vm1, %v1930_v28, %v1931_v30  ;;  %v2716_v28 = vld [vmem:[%s4710_s11 + $0x8] sm:$0xff] }
 0x8b6   :  { %v1942_v10 = vmax.f32 %v1910_v7, %v1934_v12  ;;  %v1924_v53 = vpop.permute.xlu1 %1923  ;;  %3062 = vmatprep.mubr.msk.f32.mxu1 %vm1951_vm7, %v1945_v38  ;;  %v3194_v62 = vpack.c.bf16 %v2716_v28, %v2715_v33 }
 0x8b7   :  { %v1932_v47 = vrot.slane %v1924_v53, 1  ;;  %v1940_v42 = vmax.f32 %v4524_v59, %v1924_v53  ;;  %v2052_v59 = vld [vmem:[%s4707_s8 + $0x18] sm:$0xff] }
 0x8b8   :  { %v1946_v48 = vmax.f32 %v1938_v29, %v1942_v10 }
 0x8b9   :  { %v1933_v39 = vsel %vm125_vm1, %v1931_v30, %v1932_v47  ;;  %v1936_v63 = vsel %vm125_vm1, %v1932_v47, %v1929_v24 }
 0x8ba   :  { %v1943_v18 = vmax.f32 %v1909_v52, %v1933_v39  ;;  %v1944_v3 = vmax.f32 %v1912_v31, %v1936_v63  ;;  %3063 = vmatmul.mubr.msk.f32.vlgmr.msra.gmra.mrb[4].mxu1 %vm1951_vm7, %v1946_v48 }
 0x8bc   :  { %v1948_v34 = vmax.f32 %v1940_v42, %v1944_v3  ;;  %v1947_v35 = vmax.f32 %v1939_v9, %v1943_v18  ;;  %v2888_v18 = vld [vmem:[%s4709_s10] ss:$0 sm:$0xff] }
 0x8be   :  { %3065 = vmatprep.mubr.msk.f32.mxu1 %vm1951_vm7, %v1947_v35 }
 0x8bf   :  { %3066 = vmatmul.mubr.msk.f32.gmra.mrb[6].mxu1 %vm1951_vm7, %v1948_v34 }
 0x8c0   :  { %3076 = vmatprep.mubr.msk.f32.mxu1 %vm3253_vm8, %v3254_v16 }
 0x98d   :  { %v3064_v0 = vpop.f32.mrb[4].mxu1 }
 0x98e   :  { %v2030_v51 = vpop.f32.mrb[5].mxu1 }
 0x98f   :  { %v3188_v14 = vpack.c.bf16 %v3064_v0, %v2030_v51 }
 0x991   :  { %3189 = vmatpush3.bf16.msra.mxu1 %v3188_v14 }
 0x992   :  { %v3067_v54 = vpop.f32.mrb[6].mxu1  ;;  %3190 = vmatprep.subr.bf16.mxu1 %v3252_v57 }
 0x993   :  { %v2040_v43 = vpop.f32.mrb[7].mxu1 }
 0x994   :  { %v3191_v55 = vpack.c.bf16 %v3067_v54, %v2040_v43 }
 0x996   :  { %3192 = vmatpush3.bf16.msra.mxu1 %v3191_v55 }
 0x997   :  { %3097 = vmatprep.subr.mxu1 %v3254_v16 }
 0x999   :  { %3077 = vmatmul.mubr.msk.f32.vlgmr.msra.gmra.mrb[8].mxu1 %vm868_vm3, %v2049_v20 }
 0x99a   :  { %3079 = vmatprep.mubr.msk.f32.mxu1 %vm3253_vm8, %v3254_v16  ;;  %3098 = vmatpush3.msra.mxu1 %v2875_v26 }
 0x99b   :  { %3107 = vmatprep.subr.mxu1 %v3254_v16 }
 0x99d   :  { %3080 = vmatmul.mubr.msk.f32.gmra.mrb[10].mxu1 %vm868_vm3, %v2050_v49 }
 0x99e   :  { %3082 = vmatprep.mubr.msk.f32.mxu1 %vm3253_vm8, %v3254_v16 }
 0x9a1   :  { %3083 = vmatmul.mubr.msk.f32.gmra.mrb[12].mxu1 %vm868_vm3, %v2051_v46 }
 0x9a2   :  { %3085 = vmatprep.mubr.msk.f32.mxu1 %vm3253_vm8, %v3254_v16 }
 0x9a5   :  { %3086 = vmatmul.mubr.msk.f32.gmra.mrb[14].mxu1 %vm868_vm3, %v2052_v59 }
 0x9a6   :  { %3088 = vmatprep.mubr.msk.f32.mxu1 %vm3253_vm8, %v3254_v16 }
 0x9a9   :  { %3089 = vmatmul.mubr.msk.f32.gmra.mrb[16].mxu1 %vm868_vm3, %v2053_v23 }
 0x9aa   :  { %3091 = vmatprep.mubr.msk.f32.mxu1 %vm3253_vm8, %v3254_v16 }
 0x9ad   :  { %3092 = vmatmul.mubr.msk.f32.gmra.mrb[18].mxu1 %vm868_vm3, %v2054_v50 }
 0x9ae   :  { %3094 = vmatprep.mubr.msk.f32.mxu1 %vm3253_vm8, %v3254_v16 }
 0x9b1   :  { %3095 = vmatmul.mubr.msk.f32.gmra.mrb[20].mxu1 %vm868_vm3, %v2055_v60 }
 0x9b2   :  { %3099 = vmatprep.mubr.msk.f32.mxu1 %vm3253_vm8, %v3254_v16 }
 0xa6c   :  { %v2143_v56 = vpop.f32.mrb[8].mxu1 }
 0xa6d   :  { %v3078_v5 = vpop.f32.mrb[9].mxu1  ;;  %3105 = vmatmul.mubr.msk.f32.vlgmr.msra.gmra.mrb[8].mxu0 %vm2180_vm9, %v2143_v56 }
 0xa6e   :  { %3113 = vmatpush3.msra.mxu0 %v2880_v45  ;;  %3114 = vmatprep.mubr.msk.f32.mxu0 %vm3253_vm8, %v3254_v16 }
 0xa6f   :  { %3122 = vmatprep.subr.mxu0 %v3254_v16 }
 0xa70   :  { %v2148_v44 = vpop.f32.mrb[10].mxu1 }
 0xa71   :  { %v3081_v40 = vpop.f32.mrb[11].mxu1  ;;  %3100 = vmatmul.mubr.msk.f32.vlgmr.msra.gmra.mrb[22].mxu1 %vm2180_vm9, %v2148_v44 }
 0xa72   :  { %3108 = vmatpush3.msra.mxu1 %v2878_v15  ;;  %3109 = vmatprep.mubr.msk.f32.mxu1 %vm3253_vm8, %v3254_v16 }
 0xa73   :  { %3117 = vmatprep.subr.mxu1 %v3254_v16 }
 0xa74   :  { %v2153_v6 = vpop.f32.mrb[12].mxu1 }
 0xa75   :  { %v3084_v2 = vpop.f32.mrb[13].mxu1  ;;  %3110 = vmatmul.mubr.msk.f32.vlgmr.msra.gmra.mrb[24].mxu1 %vm2180_vm9, %v2153_v6 }
 0xa76   :  { %3118 = vmatpush3.msra.mxu1 %v2882_v13  ;;  %3119 = vmatprep.mubr.msk.f32.mxu1 %vm3253_vm8, %v3254_v16 }
 0xa77   :  { %3127 = vmatprep.subr.mxu1 %v3254_v16 }
 0xa78   :  { %v2158_v1 = vpop.f32.mrb[14].mxu1 }
 0xa79   :  { %v3087_v32 = vpop.f32.mrb[15].mxu1  ;;  %3115 = vmatmul.mubr.msk.f32.vlgmr.msra.gmra.mrb[10].mxu0 %vm2180_vm9, %v2158_v1 }
 0xa7a   :  { %3123 = vmatpush3.msra.mxu0 %v2884_v58  ;;  %3124 = vmatprep.mubr.msk.f32.mxu0 %vm3253_vm8, %v3254_v16 }
 0xa7b   :  { %3193 = vmatprep.subr.bf16.mxu0 %v3252_v57 }
 0xa7c   :  { %v2163_v36 = vpop.f32.mrb[16].mxu1 }
 0xa7d   :  { %v3090_v61 = vpop.f32.mrb[17].mxu1  ;;  %3120 = vmatmul.mubr.msk.f32.vlgmr.msra.gmra.mrb[26].mxu1 %vm2180_vm9, %v2163_v36 }
 0xa7e   :  { %3128 = vmatpush3.msra.mxu1 %v2886_v25  ;;  %3129 = vmatprep.mubr.msk.f32.mxu1 %vm3253_vm8, %v3254_v16 }
 0xa80   :  { %v2168_v8 = vpop.f32.mrb[18].mxu1 }
 0xa81   :  { %v3093_v11 = vpop.f32.mrb[19].mxu1  ;;  %3125 = vmatmul.mubr.msk.f32.vlgmr.msra.gmra.mrb[12].mxu0 %vm2180_vm9, %v2168_v8 }
 0xa82   :  { %3140 = vmatprep.mubr.msk.f32.mxu0 %vm3253_vm8, %v3254_v16  ;;  %3195 = vmatpush3.bf16.msra.mxu0 %v3194_v62 }
 0xa83   :  { %3196 = vmatprep.subr.bf16.mxu0 %v3252_v57  ;;  %v2889_v57 = vld [vmem:[%s4711_s12] ss:$0 sm:$0xff] }
 0xa84   :  { %v2173_v41 = vpop.f32.mrb[20].mxu1 }
 0xa85   :  { %v3096_v24 = vpop.f32.mrb[21].mxu1  ;;  %3130 = vmatmul.mubr.msk.f32.vlgmr.msra.gmra.mrb[28].mxu1 %vm2180_vm9, %v2173_v41 }
 0xa86   :  { %3199 = vmatpush3.bf16.msk.msra.mxu0 %vm3198_vm12, %v3197_v37 }
 0xb40   :  { %v2323_v22 = vpop.f32.mrb[8].mxu0 }
 0xb41   :  { %v3106_v27 = vpop.f32.mrb[9].mxu0 }
 0xb44   :  { %v2250_v30 = vpop.f32.mrb[22].mxu1 }
 0xb45   :  { %v2324_v38 = vadd.f32 %v2323_v22, %v2250_v30  ;;  %v3101_v7 = vpop.f32.mrb[23].mxu1 }
 0xb48   :  { %v2398_v12 = vpop.f32.mrb[24].mxu1 }
 0xb49   :  { %v2402_v4 = vadd.f32 %v2398_v12, %v2324_v38  ;;  %v3111_v29 = vpop.f32.mrb[25].mxu1 }
 0xb4c   :  { %v2474_v10 = vpop.f32.mrb[10].mxu0 }
 0xb4d   :  { %v2478_v53 = vadd.f32 %v2474_v10, %v2402_v4  ;;  %v3116_v47 = vpop.f32.mrb[11].mxu0 }
 0xb50   :  { %v2550_v48 = vpop.f32.mrb[26].mxu1 }
 0xb51   :  { %v2554_v52 = vadd.f32 %v2550_v48, %v2478_v53  ;;  %v3121_v31 = vpop.f32.mrb[27].mxu1 }
 0xb54   :  { %v2626_v39 = vpop.f32.mrb[12].mxu0 }
 0xb55   :  { %v2630_v63 = vadd.f32 %v2626_v39, %v2554_v52  ;;  %v3126_v9 = vpop.f32.mrb[13].mxu0 }
 0xb58   :  { %v2702_v42 = vpop.f32.mrb[28].mxu1 }
 0xb59   :  { %v2706_v3 = vadd.f32 %v2702_v42, %v2630_v63  ;;  %v3131_v34 = vpop.f32.mrb[29].mxu1 }
 0xb5b   :  { %v2714_v35 = vadd.f32 %v2888_v18, %v2706_v3 }
 0xb5d   :  { %3141 = vmatmul.mubr.msk.f32.vlgmr.msra.gmra.mrb[14].mxu0 %vm2726_vm13, %v2714_v35 }
 0xc30   :  { %v2800_v16 = vpop.f32.mrb[14].mxu0 }
 0xc31   :  { %v2801_v0 = vadd.f32 %v2889_v57, %v2800_v16  ;;  %v3142_v51 = vpop.f32.mrb[15].mxu0 }
 0xc33   :  { %2804 = vst [vmem:[%s4712_s13] sm:$0xff] %v2801_v0 }
 0xc34   :  { %2809 = vsyncpa [#allocation4], 1 }

</bundles_post_ra>
